<compile_context>
chip_gen: v7x
topology: tpu7x:2x2x1
jax: 0.10.0
libtpu: 0.0.40
codegen_flags: <defaults>
</compile_context>

<pallas_src>
import jax
import jax.numpy as jnp
from jax import lax
from jax.experimental import pallas as pl
from jax.experimental.pallas import tpu as pltpu

# ----- synthetic small Llama-ish config (shapes implied by the forward) -----
B = 2            # batch
S = 8            # new sequence length
T = 4            # tokens per MIDI event (embedded then summed over dim=-2)
P = 4            # past (cached) sequence length
V = 64           # vocab size
H = 32           # hidden size
NH = 4           # attention heads
DH = H // NH     # head dim
I = 64           # MLP intermediate size
L = 2            # decoder layers
TOT = P + S      # kv length after this step
EPS = 1e-6
NEG_INF = -1e30

_HAS_EINSHAPE = hasattr(pltpu, "einshape")


def _split_heads(x2d):
    """(R, H) lane-dense -> (NH, R, DH) head-major (single layout-aware permute)."""
    r = x2d.shape[0]
    if _HAS_EINSHAPE:
        return pltpu.einshape("rnd->nrd", x2d.reshape(r, NH, DH))
    # fallback for older jax: per-head slices + one stack
    return jnp.stack([x2d[:, n * DH:(n + 1) * DH] for n in range(NH)], axis=0)


def _merge_heads(x3d):
    """(NH, R, DH) -> (R, H) lane-dense."""
    r = x3d.shape[1]
    if _HAS_EINSHAPE:
        return pltpu.einshape("nrd->rnd", x3d).reshape(r, H)
    return jnp.concatenate([x3d[n] for n in range(NH)], axis=-1)


def _rmsnorm(x, w):
    var = jnp.mean(x * x, axis=-1, keepdims=True)
    return x * lax.rsqrt(var + EPS) * w


# ---------------------------------------------------------------------------
# Fused kernel body: one (batch b, layer l) grid step.
#   inputs : ids, emb, cos, sin(signed), rot, final_ln,
#            ln1, wqkv, wo, ln2, wgu, wd, past_k, past_v   (per-layer stacked)
#   outputs: last_hidden (B,S,H), new_k/new_v (L,B,S,NH*DH) lane-dense
#   scratch: x_ref (S,H) f32 residual stream, persists across the layer axis
# ---------------------------------------------------------------------------
def _decoder_kernel(ids_ref, emb_ref, cos_ref, sin_ref, rot_ref, fln_ref,
                    ln1_ref, wqkv_ref, wo_ref, ln2_ref, wgu_ref, wd_ref,
                    pk_ref, pv_ref,
                    y_ref, nk_ref, nv_ref,
                    x_ref):
    l = pl.program_id(1)

    # ---- embed_tokens(x).sum(dim=-2): multi-hot counts x embedding (layer 0) ----
    @pl.when(l == 0)
    def _():
        ids = ids_ref[0]                                            # (S, T) int32
        iota_v = lax.broadcasted_iota(jnp.int32, (S, T, V), 2)
        counts = jnp.sum((iota_v == ids[:, :, None]).astype(jnp.float32), axis=1)
        x_ref[...] = jnp.dot(counts.astype(jnp.bfloat16), emb_ref[...],
                             preferred_element_type=jnp.float32)    # (S, H) f32

    x = x_ref[...]                                                  # (S, H) f32

    cos = cos_ref[...]       # (S, H) f32, per-head cos tiled on lanes
    sinr = sin_ref[...]      # (S, H) f32, per-head sin tiled on lanes
    rot = rot_ref[...]       # (H, H) f32 block-diag rotate-half (+/-1) matrix

    def rope(u):             # (S, H) f32, lane-dense; rotation rides the MXU
        return u * cos + jnp.dot(u, rot, preferred_element_type=jnp.float32) * sinr

    # ---------------- attention block ----------------
    h = _rmsnorm(x, ln1_ref[0])                                     # (S, H) f32
    qkv = jnp.dot(h.astype(jnp.bfloat16), wqkv_ref[0],
                  preferred_element_type=jnp.float32)               # (S, 3H) f32
    q2 = rope(qkv[:, :H])
    k2 = rope(qkv[:, H:2 * H])
    v2 = qkv[:, 2 * H:]

    # lane-dense cache writeback: only the S new rows, heads packed on lanes.
    nk_ref[0, 0] = k2
    nv_ref[0, 0] = v2

    # K/V as values (never read back through the just-written output refs).
    k_all = jnp.concatenate([pk_ref[0, 0], k2], axis=0)             # (TOT, H) f32
    v_all = jnp.concatenate([pv_ref[0, 0], v2], axis=0)

    scale = 1.0 / (DH ** 0.5)
    q_h = _split_heads(q2 * scale)                                  # (NH, S, DH)
    k_h = _split_heads(k_all)                                       # (NH, TOT, DH)
    v_h = _split_heads(v_all)

    sc = jnp.einsum('nsd,ntd->nst',
                    q_h.astype(jnp.bfloat16), k_h.astype(jnp.bfloat16),
                    preferred_element_type=jnp.float32)             # (NH, S, TOT)
    key_pos = lax.broadcasted_iota(jnp.int32, (S, TOT), 1)
    qry_pos = lax.broadcasted_iota(jnp.int32, (S, TOT), 0) + P
    sc = jnp.where((key_pos <= qry_pos)[None], sc, NEG_INF)         # f32 mask path
    sc = sc - jnp.max(sc, axis=-1, keepdims=True)
    p = jnp.exp(sc)
    p = p * pl.reciprocal(jnp.sum(p, axis=-1, keepdims=True), approx=True)
    attn = jnp.einsum('nst,ntd->nsd',
                      p.astype(jnp.bfloat16), v_h.astype(jnp.bfloat16),
                      preferred_element_type=jnp.float32)           # (NH, S, DH)
    attn2 = _merge_heads(attn)                                      # (S, H)
    x = x + jnp.dot(attn2.astype(jnp.bfloat16), wo_ref[0],
                    preferred_element_type=jnp.float32)

    # ---------------- SwiGLU MLP ----------------
    h2 = _rmsnorm(x, ln2_ref[0])
    gu = jnp.dot(h2.astype(jnp.bfloat16), wgu_ref[0],
                 preferred_element_type=jnp.float32)                # (S, 2I)
    g = gu[:, :I]
    u = gu[:, I:]
    m = g * u / (1.0 + jnp.exp(-g))                                 # SiLU(g)*u, f32
    x = x + jnp.dot(m.astype(jnp.bfloat16), wd_ref[0],
                    preferred_element_type=jnp.float32)

    x_ref[...] = x
    # keep the revisited output block defined every step; overwritten on last layer
    y_ref[0] = x

    @pl.when(l == L - 1)
    def _():
        y_ref[0] = _rmsnorm(x, fln_ref[...])                        # final RMSNorm


# ---------------------------------------------------------------------------
# Wrapper mirroring MIDIModelBase.forward: one pallas_call total.
# ---------------------------------------------------------------------------
def midi_model_base_forward(ids, past_kv, params):
    # RoPE tables for absolute positions P .. P+S-1, tiled per head (lane-dense).
    pos = (P + jnp.arange(S)).astype(jnp.float32)
    inv_freq = 1.0 / (10000.0 ** (jnp.arange(0, DH, 2).astype(jnp.float32) / DH))
    freqs = pos[:, None] * inv_freq[None, :]                        # (S, DH//2)
    cos = jnp.concatenate([jnp.cos(freqs), jnp.cos(freqs)], axis=-1)
    sin = jnp.concatenate([jnp.sin(freqs), jnp.sin(freqs)], axis=-1)
    cos_big = jnp.tile(cos, (1, NH))                                # (S, H)
    sin_big = jnp.tile(sin, (1, NH))
    # block-diagonal rotate-half matrix with the sign folded in:
    #   (x @ rot)[:, n*DH+d] = -x[:, n*DH+d+DH/2] (d < DH/2), +x[:, n*DH+d-DH/2] else
    half = DH // 2
    eye = jnp.eye(half, dtype=jnp.float32)
    zero = jnp.zeros((half, half), jnp.float32)
    r_head = jnp.concatenate(
        [jnp.concatenate([zero, eye], axis=1),
         jnp.concatenate([-eye, zero], axis=1)], axis=0)            # (DH, DH)
    rot = jnp.kron(jnp.eye(NH, dtype=jnp.float32), r_head)          # (H, H)

    # stacked lane-dense past K/V: (L, B, P, NH*DH)
    def to_lane_dense(t):                                           # (B,NH,P,DH)
        return t.transpose(0, 2, 1, 3).reshape(B, P, H)
    past_k_ld = jnp.stack([to_lane_dense(past_kv[l][0]) for l in range(L)])
    past_v_ld = jnp.stack([to_lane_dense(past_kv[l][1]) for l in range(L)])

    inputs = [ids, params["embed"], cos_big, sin_big, rot, params["final_ln"],
              params["ln1"], params["wqkv"], params["wo"],
              params["ln2"], params["wgu"], params["wd"],
              past_k_ld, past_v_ld]

    in_specs = [
        pl.BlockSpec((1, S, T),     lambda b, l: (b, 0, 0)),        # ids
        pl.BlockSpec((V, H),        lambda b, l: (0, 0)),           # embedding
        pl.BlockSpec((S, H),        lambda b, l: (0, 0)),           # cos (tiled)
        pl.BlockSpec((S, H),        lambda b, l: (0, 0)),           # sin (tiled)
        pl.BlockSpec((H, H),        lambda b, l: (0, 0)),           # rotate-half mat
        pl.BlockSpec((1, H),        lambda b, l: (0, 0)),           # final RMSNorm w
        pl.BlockSpec((1, 1, H),     lambda b, l: (l, 0, 0)),        # ln1
        pl.BlockSpec((1, H, 3 * H), lambda b, l: (l, 0, 0)),        # wqkv (merged)
        pl.BlockSpec((1, H, H),     lambda b, l: (l, 0, 0)),        # wo
        pl.BlockSpec((1, 1, H),     lambda b, l: (l, 0, 0)),        # ln2
        pl.BlockSpec((1, H, 2 * I), lambda b, l: (l, 0, 0)),        # w gate|up
        pl.BlockSpec((1, I, H),     lambda b, l: (l, 0, 0)),        # w down
        pl.BlockSpec((1, 1, P, H),  lambda b, l: (l, b, 0, 0)),     # past K lane-dense
        pl.BlockSpec((1, 1, P, H),  lambda b, l: (l, b, 0, 0)),     # past V lane-dense
    ]
    out_specs = [
        pl.BlockSpec((1, S, H),     lambda b, l: (b, 0, 0)),        # last hidden
        pl.BlockSpec((1, 1, S, H),  lambda b, l: (l, b, 0, 0)),     # new K rows
        pl.BlockSpec((1, 1, S, H),  lambda b, l: (l, b, 0, 0)),     # new V rows
    ]
    out_shape = (
        jax.ShapeDtypeStruct((B, S, H), jnp.float32),
        jax.ShapeDtypeStruct((L, B, S, H), jnp.float32),
        jax.ShapeDtypeStruct((L, B, S, H), jnp.float32),
    )

    flops_layer = (2 * S * H * 3 * H            # qkv
                   + 2 * (2 * S * H * H)        # rope rotation (q, k)
                   + 2 * S * H * H              # wo
                   + 2 * S * H * 2 * I          # gate/up
                   + 2 * S * I * H              # down
                   + 2 * 2 * NH * S * TOT * DH)  # qk^T + pv
    flops = B * (2 * S * V * H + L * flops_layer)
    transc = B * L * (NH * S * TOT + S * I) + B * (2 * L + 1) * S
    bytes_acc = (sum(int(a.size) * a.dtype.itemsize for a in inputs)
                 + (B * S * H + 2 * L * B * S * H) * 4)

    y, new_k, new_v = pl.pallas_call(
        _decoder_kernel,
        out_shape=out_shape,
        grid=(B, L),
        in_specs=in_specs,
        out_specs=out_specs,
        scratch_shapes=[pltpu.VMEM((S, H), jnp.float32)],           # residual stream
        compiler_params=pltpu.CompilerParams(
            dimension_semantics=("parallel", "arbitrary"),
            vmem_limit_bytes=48 * 1024 * 1024),
        cost_estimate=pl.CostEstimate(flops=flops, transcendentals=transc,
                                      bytes_accessed=bytes_acc),
    )(*inputs)

    # Assemble the HF legacy cache: unchanged past rows + the S new rows.
    # TODO(synk): in a production decode loop the cache would be preallocated at
    # max length in HBM and updated in place via input_output_aliases (+ pl.ANY
    # manual DMA of just the S new rows); the legacy-cache return interface of
    # MIDIModelBase forces this wrapper-side concatenate.
    def to_heads_layout(t):                                         # (B,S,H)->(B,NH,S,DH)
        return t.reshape(B, S, NH, DH).transpose(0, 2, 1, 3)
    new_cache = tuple(
        (jnp.concatenate([past_kv[l][0], to_heads_layout(new_k[l])], axis=2),
         jnp.concatenate([past_kv[l][1], to_heads_layout(new_v[l])], axis=2))
        for l in range(L))
    return y, new_cache


# ---------------------------------------------------------------------------
# Deterministic synthetic parameters (stacked per-layer, bf16 MXU weights).
# ---------------------------------------------------------------------------
def init_params(key):
    ks = jax.random.split(key, 5)

    def nrm(k, shape):
        return (jax.random.normal(k, shape, jnp.float32) * 0.02).astype(jnp.bfloat16)

    return {
        "embed": nrm(ks[0], (V, H)),
        "final_ln": jnp.ones((1, H), jnp.float32),
        "ln1": jnp.ones((L, 1, H), jnp.float32),
        "ln2": jnp.ones((L, 1, H), jnp.float32),
        "wqkv": nrm(ks[1], (L, H, 3 * H)),     # merged Q|K|V
        "wo":   nrm(ks[2], (L, H, H)),
        "wgu":  nrm(ks[3], (L, H, 2 * I)),     # merged gate|up
        "wd":   nrm(ks[4], (L, I, H)),
    }


if __name__ == "__main__":
    root = jax.random.PRNGKey(0)
    k_param, k_ids, k_cache = jax.random.split(root, 3)

    params = init_params(k_param)

    # token ids: (B, S, T) -- T event-sub-tokens embedded and summed (dim=-2)
    ids = jax.random.randint(k_ids, (B, S, T), 0, V, dtype=jnp.int32)

    # legacy past_kv: tuple over layers of (k, v), each (B, NH, P, DH)
    ck = jax.random.split(k_cache, 2 * L)
    past_kv = tuple(
        (jax.random.normal(ck[2 * l], (B, NH, P, DH), jnp.float32) * 0.02,
         jax.random.normal(ck[2 * l + 1], (B, NH, P, DH), jnp.float32) * 0.02)
        for l in range(L)
    )

    fwd = jax.jit(midi_model_base_forward)
    last_hidden, new_cache = fwd(ids, past_kv, params)
    jax.block_until_ready((last_hidden, new_cache))

    assert last_hidden.shape == (B, S, H)
    assert new_cache[0][0].shape == (B, NH, P + S, DH)
    # past rows must be carried through unchanged into the updated cache
    assert bool(jnp.allclose(new_cache[0][0][:, :, :P, :], past_kv[0][0]))
    assert bool(jnp.all(jnp.isfinite(last_hidden)))
    print("KERNEL_OK")
</pallas_src>

<mosaic_0001>
module attributes {stable_mosaic.version = 11 : i64} {
  func.func @_decoder_kernel(%arg0: i32, %arg1: i32, %arg2: memref<1x8x4xi32, #tpu.memory_space<vmem>>, %arg3: memref<64x32xbf16, #tpu.memory_space<vmem>>, %arg4: memref<8x32xf32, #tpu.memory_space<vmem>>, %arg5: memref<8x32xf32, #tpu.memory_space<vmem>>, %arg6: memref<32x32xf32, #tpu.memory_space<vmem>>, %arg7: memref<1x32xf32, #tpu.memory_space<vmem>>, %arg8: memref<1x1x32xf32, #tpu.memory_space<vmem>>, %arg9: memref<1x32x96xbf16, #tpu.memory_space<vmem>>, %arg10: memref<1x32x32xbf16, #tpu.memory_space<vmem>>, %arg11: memref<1x1x32xf32, #tpu.memory_space<vmem>>, %arg12: memref<1x32x128xbf16, #tpu.memory_space<vmem>>, %arg13: memref<1x64x32xbf16, #tpu.memory_space<vmem>>, %arg14: memref<1x1x4x32xf32, #tpu.memory_space<vmem>>, %arg15: memref<1x1x4x32xf32, #tpu.memory_space<vmem>>, %arg16: memref<1x8x32xf32, #tpu.memory_space<vmem>>, %arg17: memref<1x1x8x32xf32, #tpu.memory_space<vmem>>, %arg18: memref<1x1x8x32xf32, #tpu.memory_space<vmem>>, %arg19: memref<8x32xf32, #tpu.memory_space<vmem>>) attributes {dimension_semantics = [#tpu.dimension_semantics<parallel>, #tpu.dimension_semantics<arbitrary>], iteration_bounds = array<i64: 2, 2>, scalar_prefetch = 0 : i64, scratch_operands = 1 : i64, tpu.core_type = #tpu.core_type<tc>, window_params = [{transform_indices = @transform_0, window_bounds = array<i64: 1, 8, 4>}, {pipeline_mode = #tpu.pipeline_mode<synchronous>, transform_indices = @transform_1, window_bounds = array<i64: 64, 32>}, {pipeline_mode = #tpu.pipeline_mode<synchronous>, transform_indices = @transform_2, window_bounds = array<i64: 8, 32>}, {pipeline_mode = #tpu.pipeline_mode<synchronous>, transform_indices = @transform_3, window_bounds = array<i64: 8, 32>}, {pipeline_mode = #tpu.pipeline_mode<synchronous>, transform_indices = @transform_4, window_bounds = array<i64: 32, 32>}, {pipeline_mode = #tpu.pipeline_mode<synchronous>, transform_indices = @transform_5, window_bounds = array<i64: 1, 32>}, {transform_indices = @transform_6, window_bounds = array<i64: 1, 1, 32>}, {transform_indices = @transform_7, window_bounds = array<i64: 1, 32, 96>}, {transform_indices = @transform_8, window_bounds = array<i64: 1, 32, 32>}, {transform_indices = @transform_9, window_bounds = array<i64: 1, 1, 32>}, {transform_indices = @transform_10, window_bounds = array<i64: 1, 32, 128>}, {transform_indices = @transform_11, window_bounds = array<i64: 1, 64, 32>}, {transform_indices = @transform_12, window_bounds = array<i64: 1, 1, 4, 32>}, {transform_indices = @transform_13, window_bounds = array<i64: 1, 1, 4, 32>}, {transform_indices = @transform_14, window_bounds = array<i64: 1, 8, 32>}, {transform_indices = @transform_15, window_bounds = array<i64: 1, 1, 8, 32>}, {transform_indices = @transform_16, window_bounds = array<i64: 1, 1, 8, 32>}]} {
    %c0_i32 = arith.constant 0 : i32
    %0 = arith.cmpi eq, %arg1, %c0_i32 : i32
    %1 = arith.extui %0 : i1 to i32
    %c0_i32_0 = arith.constant 0 : i32
    %2 = arith.cmpi ne, %1, %c0_i32_0 : i32
    scf.if %2 {
      %c0_67 = arith.constant 0 : index
      %c0_68 = arith.constant 0 : index
      %c0_69 = arith.constant 0 : index
      %128 = vector.load %arg2[%c0_67, %c0_68, %c0_69] : memref<1x8x4xi32, #tpu.memory_space<vmem>>, vector<1x8x4xi32>
      %129 = vector.shape_cast %128 : vector<1x8x4xi32> to vector<8x4xi32>
      %130 = tpu.iota {dimensions = array<i32: 2>} : vector<8x4x64xi32>
      %131 = vector.shape_cast %129 : vector<8x4xi32> to vector<8x4x1xi32>
      %132 = vector.broadcast %131 : vector<8x4x1xi32> to vector<8x4x64xi32>
      %133 = arith.cmpi eq, %130, %132 : vector<8x4x64xi32>
      %134 = arith.extui %133 : vector<8x4x64xi1> to vector<8x4x64xi32>
      %135 = arith.sitofp %134 : vector<8x4x64xi32> to vector<8x4x64xf32>
      %cst_70 = arith.constant dense<0.000000e+00> : vector<8x64xf32>
      %136 = vector.multi_reduction <add>, %135, %cst_70 [1] : vector<8x4x64xf32> to vector<8x64xf32>
      %137 = arith.truncf %136 : vector<8x64xf32> to vector<8x64xbf16>
      %c0_71 = arith.constant 0 : index
      %c0_72 = arith.constant 0 : index
      %138 = vector.load %arg3[%c0_71, %c0_72] : memref<64x32xbf16, #tpu.memory_space<vmem>>, vector<64x32xbf16>
      %cst_73 = arith.constant dense<0.000000e+00> : vector<8x32xf32>
      %139 = tpu.matmul %137, %138, %cst_73 {dimension_numbers = #tpu.dot_dimension_numbers<[1], [0], [0], [1], [0, 0, 1, 1], [], []>} : vector<8x64xbf16>, vector<64x32xbf16>, vector<8x32xf32> -> vector<8x32xf32>
      %c0_74 = arith.constant 0 : index
      %c0_75 = arith.constant 0 : index
      %140 = vector.load %arg19[%c0_74, %c0_75] : memref<8x32xf32, #tpu.memory_space<vmem>>, vector<8x32xf32>
      tpu.vector_store %arg19[%c0_74, %c0_75], %139 {strides = array<i32>} : memref<8x32xf32, #tpu.memory_space<vmem>>, vector<8x32xf32>,
    } else {
    }
    %c0 = arith.constant 0 : index
    %c0_1 = arith.constant 0 : index
    %3 = vector.load %arg19[%c0, %c0_1] : memref<8x32xf32, #tpu.memory_space<vmem>>, vector<8x32xf32>
    %c0_2 = arith.constant 0 : index
    %c0_3 = arith.constant 0 : index
    %4 = vector.load %arg4[%c0_2, %c0_3] : memref<8x32xf32, #tpu.memory_space<vmem>>, vector<8x32xf32>
    %c0_4 = arith.constant 0 : index
    %c0_5 = arith.constant 0 : index
    %5 = vector.load %arg5[%c0_4, %c0_5] : memref<8x32xf32, #tpu.memory_space<vmem>>, vector<8x32xf32>
    %c0_6 = arith.constant 0 : index
    %c0_7 = arith.constant 0 : index
    %6 = vector.load %arg6[%c0_6, %c0_7] : memref<32x32xf32, #tpu.memory_space<vmem>>, vector<32x32xf32>
    %c0_8 = arith.constant 0 : index
    %c0_9 = arith.constant 0 : index
    %c0_10 = arith.constant 0 : index
    %7 = vector.load %arg8[%c0_8, %c0_9, %c0_10] : memref<1x1x32xf32, #tpu.memory_space<vmem>>, vector<1x1x32xf32>
    %8 = vector.shape_cast %7 : vector<1x1x32xf32> to vector<1x32xf32>
    %9 = arith.mulf %3, %3 : vector<8x32xf32>
    %cst = arith.constant dense<0.000000e+00> : vector<8xf32>
    %10 = vector.multi_reduction <add>, %9, %cst [1] : vector<8x32xf32> to vector<8xf32>
    %11 = vector.shape_cast %10 : vector<8xf32> to vector<8x1xf32>
    %cst_11 = arith.constant 3.200000e+01 : f32
    %12 = vector.broadcast %cst_11 : f32 to vector<8x1xf32>
    %13 = arith.divf %11, %12 : vector<8x1xf32>
    %cst_12 = arith.constant 9.99999997E-7 : f32
    %14 = vector.broadcast %cst_12 : f32 to vector<8x1xf32>
    %15 = arith.addf %13, %14 : vector<8x1xf32>
    %16 = math.rsqrt %15 : vector<8x1xf32>
    %17 = vector.broadcast %16 : vector<8x1xf32> to vector<8x32xf32>
    %18 = arith.mulf %3, %17 : vector<8x32xf32>
    %19 = vector.broadcast %8 : vector<1x32xf32> to vector<8x32xf32>
    %20 = arith.mulf %18, %19 : vector<8x32xf32>
    %21 = arith.truncf %20 : vector<8x32xf32> to vector<8x32xbf16>
    %c0_13 = arith.constant 0 : index
    %c0_14 = arith.constant 0 : index
    %c0_15 = arith.constant 0 : index
    %22 = vector.load %arg9[%c0_13, %c0_14, %c0_15] : memref<1x32x96xbf16, #tpu.memory_space<vmem>>, vector<1x32x96xbf16>
    %23 = vector.shape_cast %22 : vector<1x32x96xbf16> to vector<32x96xbf16>
    %cst_16 = arith.constant dense<0.000000e+00> : vector<8x96xf32>
    %24 = tpu.matmul %21, %23, %cst_16 {dimension_numbers = #tpu.dot_dimension_numbers<[1], [0], [0], [1], [0, 0, 1, 1], [], []>} : vector<8x32xbf16>, vector<32x96xbf16>, vector<8x96xf32> -> vector<8x96xf32>
    %25 = vector.extract_strided_slice %24 {offsets = [0, 0], sizes = [8, 32], strides = [1, 1]} : vector<8x96xf32> to vector<8x32xf32>
    %26 = arith.mulf %25, %4 : vector<8x32xf32>
    %cst_17 = arith.constant dense<0.000000e+00> : vector<8x32xf32>
    %27 = tpu.matmul %25, %6, %cst_17 {dimension_numbers = #tpu.dot_dimension_numbers<[1], [0], [0], [1], [0, 0, 1, 1], [], []>} : vector<8x32xf32>, vector<32x32xf32>, vector<8x32xf32> -> vector<8x32xf32>
    %28 = arith.mulf %27, %5 : vector<8x32xf32>
    %29 = arith.addf %26, %28 : vector<8x32xf32>
    %30 = vector.extract_strided_slice %24 {offsets = [0, 32], sizes = [8, 32], strides = [1, 1]} : vector<8x96xf32> to vector<8x32xf32>
    %31 = arith.mulf %30, %4 : vector<8x32xf32>
    %cst_18 = arith.constant dense<0.000000e+00> : vector<8x32xf32>
    %32 = tpu.matmul %30, %6, %cst_18 {dimension_numbers = #tpu.dot_dimension_numbers<[1], [0], [0], [1], [0, 0, 1, 1], [], []>} : vector<8x32xf32>, vector<32x32xf32>, vector<8x32xf32> -> vector<8x32xf32>
    %33 = arith.mulf %32, %5 : vector<8x32xf32>
    %34 = arith.addf %31, %33 : vector<8x32xf32>
    %35 = vector.extract_strided_slice %24 {offsets = [0, 64], sizes = [8, 32], strides = [1, 1]} : vector<8x96xf32> to vector<8x32xf32>
    %c0_19 = arith.constant 0 : index
    %c0_20 = arith.constant 0 : index
    %c0_21 = arith.constant 0 : index
    %c0_22 = arith.constant 0 : index
    %36 = vector.load %arg17[%c0_19, %c0_20, %c0_21, %c0_22] : memref<1x1x8x32xf32, #tpu.memory_space<vmem>>, vector<1x1x8x32xf32>
    %37 = vector.shape_cast %36 : vector<1x1x8x32xf32> to vector<8x32xf32>
    %38 = vector.shape_cast %34 : vector<8x32xf32> to vector<1x1x8x32xf32>
    tpu.vector_store %arg17[%c0_19, %c0_20, %c0_21, %c0_22], %38 {strides = array<i32>} : memref<1x1x8x32xf32, #tpu.memory_space<vmem>>, vector<1x1x8x32xf32>,
    %c0_23 = arith.constant 0 : index
    %c0_24 = arith.constant 0 : index
    %c0_25 = arith.constant 0 : index
    %c0_26 = arith.constant 0 : index
    %39 = vector.load %arg18[%c0_23, %c0_24, %c0_25, %c0_26] : memref<1x1x8x32xf32, #tpu.memory_space<vmem>>, vector<1x1x8x32xf32>
    %40 = vector.shape_cast %39 : vector<1x1x8x32xf32> to vector<8x32xf32>
    %41 = vector.shape_cast %35 : vector<8x32xf32> to vector<1x1x8x32xf32>
    tpu.vector_store %arg18[%c0_23, %c0_24, %c0_25, %c0_26], %41 {strides = array<i32>} : memref<1x1x8x32xf32, #tpu.memory_space<vmem>>, vector<1x1x8x32xf32>,
    %c0_27 = arith.constant 0 : index
    %c0_28 = arith.constant 0 : index
    %c0_29 = arith.constant 0 : index
    %c0_30 = arith.constant 0 : index
    %42 = vector.load %arg14[%c0_27, %c0_28, %c0_29, %c0_30] : memref<1x1x4x32xf32, #tpu.memory_space<vmem>>, vector<1x1x4x32xf32>
    %43 = vector.shape_cast %42 : vector<1x1x4x32xf32> to vector<4x32xf32>
    %44 = tpu.concatenate %43, %34 in 0 : vector<4x32xf32>, vector<8x32xf32> -> vector<12x32xf32>
    %c0_31 = arith.constant 0 : index
    %c0_32 = arith.constant 0 : index
    %c0_33 = arith.constant 0 : index
    %c0_34 = arith.constant 0 : index
    %45 = vector.load %arg15[%c0_31, %c0_32, %c0_33, %c0_34] : memref<1x1x4x32xf32, #tpu.memory_space<vmem>>, vector<1x1x4x32xf32>
    %46 = vector.shape_cast %45 : vector<1x1x4x32xf32> to vector<4x32xf32>
    %47 = tpu.concatenate %46, %35 in 0 : vector<4x32xf32>, vector<8x32xf32> -> vector<12x32xf32>
    %cst_35 = arith.constant 0.353553385 : f32
    %48 = vector.broadcast %cst_35 : f32 to vector<8x32xf32>
    %49 = arith.mulf %29, %48 : vector<8x32xf32>
    %50 = vector.shape_cast %49 : vector<8x32xf32> to vector<8x4x8xf32>
    %51 = tpu.transpose %50, [1, 0, 2] : vector<8x4x8xf32> -> vector<4x8x8xf32>
    %52 = vector.shape_cast %44 : vector<12x32xf32> to vector<12x4x8xf32>
    %53 = tpu.transpose %52, [1, 0, 2] : vector<12x4x8xf32> -> vector<4x12x8xf32>
    %54 = vector.shape_cast %47 : vector<12x32xf32> to vector<12x4x8xf32>
    %55 = tpu.transpose %54, [1, 0, 2] : vector<12x4x8xf32> -> vector<4x12x8xf32>
    %56 = arith.truncf %51 : vector<4x8x8xf32> to vector<4x8x8xbf16>
    %57 = arith.truncf %53 : vector<4x12x8xf32> to vector<4x12x8xbf16>
    "tpu.trace_start"() <{level = 10 : i32, message = "nsd,ntd->nst"}> : () -> ()
    %cst_36 = arith.constant dense<0.000000e+00> : vector<4x8x12xf32>
    %58 = tpu.matmul %56, %57, %cst_36 {dimension_numbers = #tpu.dot_dimension_numbers<[2], [2], [1], [1], [0, 0, 0, 1, 1, 1], [0], [0]>} : vector<4x8x8xbf16>, vector<4x12x8xbf16>, vector<4x8x12xf32> -> vector<4x8x12xf32>
    "tpu.trace_stop"() : () -> ()
    %59 = tpu.iota {dimensions = array<i32: 1>} : vector<8x12xi32>
    %60 = tpu.iota {dimensions = array<i32: 0>} : vector<8x12xi32>
    %c4_i32 = arith.constant 4 : i32
    %61 = vector.broadcast %c4_i32 : i32 to vector<8x12xi32>
    %62 = arith.addi %60, %61 : vector<8x12xi32>
    %63 = arith.cmpi sle, %59, %62 : vector<8x12xi32>
    %64 = vector.shape_cast %63 : vector<8x12xi1> to vector<1x8x12xi1>
    %cst_37 = arith.constant -1.000000e+30 : f32
    %65 = vector.shape_cast %64 : vector<1x8x12xi1> to vector<1x8x12xi1>
    %66 = vector.broadcast %65 : vector<1x8x12xi1> to vector<4x8x12xi1>
    %67 = vector.broadcast %cst_37 : f32 to vector<4x8x12xf32>
    %68 = arith.select %66, %58, %67 : vector<4x8x12xi1>, vector<4x8x12xf32>
    %cst_38 = arith.constant dense<0xFF800000> : vector<4x8xf32>
    %69 = vector.multi_reduction <maximumf>, %68, %cst_38 [2] : vector<4x8x12xf32> to vector<4x8xf32>
    %70 = vector.shape_cast %69 : vector<4x8xf32> to vector<4x8x1xf32>
    %71 = vector.broadcast %70 : vector<4x8x1xf32> to vector<4x8x12xf32>
    %72 = arith.subf %68, %71 : vector<4x8x12xf32>
    %73 = math.exp %72 : vector<4x8x12xf32>
    %cst_39 = arith.constant dense<0.000000e+00> : vector<4x8xf32>
    %74 = vector.multi_reduction <add>, %73, %cst_39 [2] : vector<4x8x12xf32> to vector<4x8xf32>
    %75 = vector.shape_cast %74 : vector<4x8xf32> to vector<4x8x1xf32>
    %76 = tpu.reciprocal %75 {approx = true} : vector<4x8x1xf32> -> vector<4x8x1xf32>
    %77 = vector.broadcast %76 : vector<4x8x1xf32> to vector<4x8x12xf32>
    %78 = arith.mulf %73, %77 : vector<4x8x12xf32>
    %79 = arith.truncf %78 : vector<4x8x12xf32> to vector<4x8x12xbf16>
    %80 = arith.truncf %55 : vector<4x12x8xf32> to vector<4x12x8xbf16>
    "tpu.trace_start"() <{level = 10 : i32, message = "nst,ntd->nsd"}> : () -> ()
    %cst_40 = arith.constant dense<0.000000e+00> : vector<4x8x8xf32>
    %81 = tpu.matmul %79, %80, %cst_40 {dimension_numbers = #tpu.dot_dimension_numbers<[2], [1], [1], [2], [0, 0, 0, 1, 1, 2], [0], [0]>} : vector<4x8x12xbf16>, vector<4x12x8xbf16>, vector<4x8x8xf32> -> vector<4x8x8xf32>
    "tpu.trace_stop"() : () -> ()
    %82 = tpu.transpose %81, [1, 0, 2] : vector<4x8x8xf32> -> vector<8x4x8xf32>
    %83 = vector.shape_cast %82 : vector<8x4x8xf32> to vector<8x32xf32>
    %84 = arith.truncf %83 : vector<8x32xf32> to vector<8x32xbf16>
    %c0_41 = arith.constant 0 : index
    %c0_42 = arith.constant 0 : index
    %c0_43 = arith.constant 0 : index
    %85 = vector.load %arg10[%c0_41, %c0_42, %c0_43] : memref<1x32x32xbf16, #tpu.memory_space<vmem>>, vector<1x32x32xbf16>
    %86 = vector.shape_cast %85 : vector<1x32x32xbf16> to vector<32x32xbf16>
    %cst_44 = arith.constant dense<0.000000e+00> : vector<8x32xf32>
    %87 = tpu.matmul %84, %86, %cst_44 {dimension_numbers = #tpu.dot_dimension_numbers<[1], [0], [0], [1], [0, 0, 1, 1], [], []>} : vector<8x32xbf16>, vector<32x32xbf16>, vector<8x32xf32> -> vector<8x32xf32>
    %88 = arith.addf %3, %87 : vector<8x32xf32>
    %c0_45 = arith.constant 0 : index
    %c0_46 = arith.constant 0 : index
    %c0_47 = arith.constant 0 : index
    %89 = vector.load %arg11[%c0_45, %c0_46, %c0_47] : memref<1x1x32xf32, #tpu.memory_space<vmem>>, vector<1x1x32xf32>
    %90 = vector.shape_cast %89 : vector<1x1x32xf32> to vector<1x32xf32>
    %91 = arith.mulf %88, %88 : vector<8x32xf32>
    %cst_48 = arith.constant dense<0.000000e+00> : vector<8xf32>
    %92 = vector.multi_reduction <add>, %91, %cst_48 [1] : vector<8x32xf32> to vector<8xf32>
    %93 = vector.shape_cast %92 : vector<8xf32> to vector<8x1xf32>
    %cst_49 = arith.constant 3.200000e+01 : f32
    %94 = vector.broadcast %cst_49 : f32 to vector<8x1xf32>
    %95 = arith.divf %93, %94 : vector<8x1xf32>
    %cst_50 = arith.constant 9.99999997E-7 : f32
    %96 = vector.broadcast %cst_50 : f32 to vector<8x1xf32>
    %97 = arith.addf %95, %96 : vector<8x1xf32>
    %98 = math.rsqrt %97 : vector<8x1xf32>
    %99 = vector.broadcast %98 : vector<8x1xf32> to vector<8x32xf32>
    %100 = arith.mulf %88, %99 : vector<8x32xf32>
    %101 = vector.broadcast %90 : vector<1x32xf32> to vector<8x32xf32>
    %102 = arith.mulf %100, %101 : vector<8x32xf32>
    %103 = arith.truncf %102 : vector<8x32xf32> to vector<8x32xbf16>
    %c0_51 = arith.constant 0 : index
    %c0_52 = arith.constant 0 : index
    %c0_53 = arith.constant 0 : index
    %104 = vector.load %arg12[%c0_51, %c0_52, %c0_53] : memref<1x32x128xbf16, #tpu.memory_space<vmem>>, vector<1x32x128xbf16>
    %105 = vector.shape_cast %104 : vector<1x32x128xbf16> to vector<32x128xbf16>
    %cst_54 = arith.constant dense<0.000000e+00> : vector<8x128xf32>
    %106 = tpu.matmul %103, %105, %cst_54 {dimension_numbers = #tpu.dot_dimension_numbers<[1], [0], [0], [1], [0, 0, 1, 1], [], []>} : vector<8x32xbf16>, vector<32x128xbf16>, vector<8x128xf32> -> vector<8x128xf32>
    %107 = vector.extract_strided_slice %106 {offsets = [0, 0], sizes = [8, 64], strides = [1, 1]} : vector<8x128xf32> to vector<8x64xf32>
    %108 = vector.extract_strided_slice %106 {offsets = [0, 64], sizes = [8, 64], strides = [1, 1]} : vector<8x128xf32> to vector<8x64xf32>
    %109 = arith.mulf %107, %108 : vector<8x64xf32>
    %cst_55 = arith.constant 0.000000e+00 : f32
    %110 = vector.broadcast %cst_55 : f32 to vector<8x64xf32>
    %111 = arith.subf %110, %107 : vector<8x64xf32>
    %112 = math.exp %111 : vector<8x64xf32>
    %cst_56 = arith.constant 1.000000e+00 : f32
    %113 = vector.broadcast %cst_56 : f32 to vector<8x64xf32>
    %114 = arith.addf %113, %112 : vector<8x64xf32>
    %115 = arith.divf %109, %114 : vector<8x64xf32>
    %116 = arith.truncf %115 : vector<8x64xf32> to vector<8x64xbf16>
    %c0_57 = arith.constant 0 : index
    %c0_58 = arith.constant 0 : index
    %c0_59 = arith.constant 0 : index
    %117 = vector.load %arg13[%c0_57, %c0_58, %c0_59] : memref<1x64x32xbf16, #tpu.memory_space<vmem>>, vector<1x64x32xbf16>
    %118 = vector.shape_cast %117 : vector<1x64x32xbf16> to vector<64x32xbf16>
    %cst_60 = arith.constant dense<0.000000e+00> : vector<8x32xf32>
    %119 = tpu.matmul %116, %118, %cst_60 {dimension_numbers = #tpu.dot_dimension_numbers<[1], [0], [0], [1], [0, 0, 1, 1], [], []>} : vector<8x64xbf16>, vector<64x32xbf16>, vector<8x32xf32> -> vector<8x32xf32>
    %120 = arith.addf %88, %119 : vector<8x32xf32>
    %c0_61 = arith.constant 0 : index
    %c0_62 = arith.constant 0 : index
    %121 = vector.load %arg19[%c0_61, %c0_62] : memref<8x32xf32, #tpu.memory_space<vmem>>, vector<8x32xf32>
    tpu.vector_store %arg19[%c0_61, %c0_62], %120 {strides = array<i32>} : memref<8x32xf32, #tpu.memory_space<vmem>>, vector<8x32xf32>,
    %c0_63 = arith.constant 0 : index
    %c0_64 = arith.constant 0 : index
    %c0_65 = arith.constant 0 : index
    %122 = vector.load %arg16[%c0_63, %c0_64, %c0_65] : memref<1x8x32xf32, #tpu.memory_space<vmem>>, vector<1x8x32xf32>
    %123 = vector.shape_cast %122 : vector<1x8x32xf32> to vector<8x32xf32>
    %124 = vector.shape_cast %120 : vector<8x32xf32> to vector<1x8x32xf32>
    tpu.vector_store %arg16[%c0_63, %c0_64, %c0_65], %124 {strides = array<i32>} : memref<1x8x32xf32, #tpu.memory_space<vmem>>, vector<1x8x32xf32>,
    %c1_i32 = arith.constant 1 : i32
    %125 = arith.cmpi eq, %arg1, %c1_i32 : i32
    %126 = arith.extui %125 : i1 to i32
    %c0_i32_66 = arith.constant 0 : i32
    %127 = arith.cmpi ne, %126, %c0_i32_66 : i32
    scf.if %127 {
      %c0_67 = arith.constant 0 : index
      %c0_68 = arith.constant 0 : index
      %128 = vector.load %arg7[%c0_67, %c0_68] : memref<1x32xf32, #tpu.memory_space<vmem>>, vector<1x32xf32>
      %129 = arith.mulf %120, %120 : vector<8x32xf32>
      %cst_69 = arith.constant dense<0.000000e+00> : vector<8xf32>
      %130 = vector.multi_reduction <add>, %129, %cst_69 [1] : vector<8x32xf32> to vector<8xf32>
      %131 = vector.shape_cast %130 : vector<8xf32> to vector<8x1xf32>
      %cst_70 = arith.constant 3.200000e+01 : f32
      %132 = vector.broadcast %cst_70 : f32 to vector<8x1xf32>
      %133 = arith.divf %131, %132 : vector<8x1xf32>
      %cst_71 = arith.constant 9.99999997E-7 : f32
      %134 = vector.broadcast %cst_71 : f32 to vector<8x1xf32>
      %135 = arith.addf %133, %134 : vector<8x1xf32>
      %136 = math.rsqrt %135 : vector<8x1xf32>
      %137 = vector.broadcast %136 : vector<8x1xf32> to vector<8x32xf32>
      %138 = arith.mulf %120, %137 : vector<8x32xf32>
      %139 = vector.broadcast %128 : vector<1x32xf32> to vector<8x32xf32>
      %140 = arith.mulf %138, %139 : vector<8x32xf32>
      %c0_72 = arith.constant 0 : index
      %c0_73 = arith.constant 0 : index
      %c0_74 = arith.constant 0 : index
      %141 = vector.load %arg16[%c0_72, %c0_73, %c0_74] : memref<1x8x32xf32, #tpu.memory_space<vmem>>, vector<1x8x32xf32>
      %142 = vector.shape_cast %141 : vector<1x8x32xf32> to vector<8x32xf32>
      %143 = vector.shape_cast %140 : vector<8x32xf32> to vector<1x8x32xf32>
      tpu.vector_store %arg16[%c0_72, %c0_73, %c0_74], %143 {strides = array<i32>} : memref<1x8x32xf32, #tpu.memory_space<vmem>>, vector<1x8x32xf32>,
    } else {
    }
    return
  }
  func.func @transform_0(%arg0: i32, %arg1: i32) -> (i32, i32, i32) {
    %c0_i32 = arith.constant 0 : i32
    %c0_i32_0 = arith.constant 0 : i32
    %c0_i32_1 = arith.constant 0 : i32
    return %arg0, %c0_i32, %c0_i32_0 : i32, i32, i32
  }
  func.func @transform_1(%arg0: i32, %arg1: i32) -> (i32, i32) {
    %c0_i32 = arith.constant 0 : i32
    %c0_i32_0 = arith.constant 0 : i32
    %c0_i32_1 = arith.constant 0 : i32
    return %c0_i32, %c0_i32_0 : i32, i32
  }
  func.func @transform_2(%arg0: i32, %arg1: i32) -> (i32, i32) {
    %c0_i32 = arith.constant 0 : i32
    %c0_i32_0 = arith.constant 0 : i32
    %c0_i32_1 = arith.constant 0 : i32
    return %c0_i32, %c0_i32_0 : i32, i32
  }
  func.func @transform_3(%arg0: i32, %arg1: i32) -> (i32, i32) {
    %c0_i32 = arith.constant 0 : i32
    %c0_i32_0 = arith.constant 0 : i32
    %c0_i32_1 = arith.constant 0 : i32
    return %c0_i32, %c0_i32_0 : i32, i32
  }
  func.func @transform_4(%arg0: i32, %arg1: i32) -> (i32, i32) {
    %c0_i32 = arith.constant 0 : i32
    %c0_i32_0 = arith.constant 0 : i32
    %c0_i32_1 = arith.constant 0 : i32
    return %c0_i32, %c0_i32_0 : i32, i32
  }
  func.func @transform_5(%arg0: i32, %arg1: i32) -> (i32, i32) {
    %c0_i32 = arith.constant 0 : i32
    %c0_i32_0 = arith.constant 0 : i32
    %c0_i32_1 = arith.constant 0 : i32
    return %c0_i32, %c0_i32_0 : i32, i32
  }
  func.func @transform_6(%arg0: i32, %arg1: i32) -> (i32, i32, i32) {
    %c0_i32 = arith.constant 0 : i32
    %c0_i32_0 = arith.constant 0 : i32
    %c0_i32_1 = arith.constant 0 : i32
    return %arg1, %c0_i32, %c0_i32_0 : i32, i32, i32
  }
  func.func @transform_7(%arg0: i32, %arg1: i32) -> (i32, i32, i32) {
    %c0_i32 = arith.constant 0 : i32
    %c0_i32_0 = arith.constant 0 : i32
    %c0_i32_1 = arith.constant 0 : i32
    return %arg1, %c0_i32, %c0_i32_0 : i32, i32, i32
  }
  func.func @transform_8(%arg0: i32, %arg1: i32) -> (i32, i32, i32) {
    %c0_i32 = arith.constant 0 : i32
    %c0_i32_0 = arith.constant 0 : i32
    %c0_i32_1 = arith.constant 0 : i32
    return %arg1, %c0_i32, %c0_i32_0 : i32, i32, i32
  }
  func.func @transform_9(%arg0: i32, %arg1: i32) -> (i32, i32, i32) {
    %c0_i32 = arith.constant 0 : i32
    %c0_i32_0 = arith.constant 0 : i32
    %c0_i32_1 = arith.constant 0 : i32
    return %arg1, %c0_i32, %c0_i32_0 : i32, i32, i32
  }
  func.func @transform_10(%arg0: i32, %arg1: i32) -> (i32, i32, i32) {
    %c0_i32 = arith.constant 0 : i32
    %c0_i32_0 = arith.constant 0 : i32
    %c0_i32_1 = arith.constant 0 : i32
    return %arg1, %c0_i32, %c0_i32_0 : i32, i32, i32
  }
  func.func @transform_11(%arg0: i32, %arg1: i32) -> (i32, i32, i32) {
    %c0_i32 = arith.constant 0 : i32
    %c0_i32_0 = arith.constant 0 : i32
    %c0_i32_1 = arith.constant 0 : i32
    return %arg1, %c0_i32, %c0_i32_0 : i32, i32, i32
  }
  func.func @transform_12(%arg0: i32, %arg1: i32) -> (i32, i32, i32, i32) {
    %c0_i32 = arith.constant 0 : i32
    %c0_i32_0 = arith.constant 0 : i32
    %c0_i32_1 = arith.constant 0 : i32
    return %arg1, %arg0, %c0_i32, %c0_i32_0 : i32, i32, i32, i32
  }
  func.func @transform_13(%arg0: i32, %arg1: i32) -> (i32, i32, i32, i32) {
    %c0_i32 = arith.constant 0 : i32
    %c0_i32_0 = arith.constant 0 : i32
    %c0_i32_1 = arith.constant 0 : i32
    return %arg1, %arg0, %c0_i32, %c0_i32_0 : i32, i32, i32, i32
  }
  func.func @transform_14(%arg0: i32, %arg1: i32) -> (i32, i32, i32) {
    %c0_i32 = arith.constant 0 : i32
    %c0_i32_0 = arith.constant 0 : i32
    %c0_i32_1 = arith.constant 0 : i32
    return %arg0, %c0_i32, %c0_i32_0 : i32, i32, i32
  }
  func.func @transform_15(%arg0: i32, %arg1: i32) -> (i32, i32, i32, i32) {
    %c0_i32 = arith.constant 0 : i32
    %c0_i32_0 = arith.constant 0 : i32
    %c0_i32_1 = arith.constant 0 : i32
    return %arg1, %arg0, %c0_i32, %c0_i32_0 : i32, i32, i32, i32
  }
  func.func @transform_16(%arg0: i32, %arg1: i32) -> (i32, i32, i32, i32) {
    %c0_i32 = arith.constant 0 : i32
    %c0_i32_0 = arith.constant 0 : i32
    %c0_i32_1 = arith.constant 0 : i32
    return %arg1, %arg0, %c0_i32, %c0_i32_0 : i32, i32, i32, i32
  }
}

</mosaic_0001>

<bundles_post_ra>
// kernel: tile.14
= control target key start
LH: loop header
LB: loop body
LE: loop exit
PB: predicated region body
PF: predicated region fallthrough
CT: control target
= control target key end

     0   :  { %vm42_vm0 = vcmask 1047556   ;;  %vm44_vm1 = vcmask 64512   ;;  %s93_s22 = smov 8   ;;  %s94_s25 = smov 16   ;;  %vm54_vm2 = vcmask 261312   ;;  %vm64_vm3 = vcmask 195712   ;;  %s146_s0 = inlined_call_operand.vmem [shape: f32[8,4,8], index: 0, kind: input, shape index: {}]   ;;  %s147_s1 = inlined_call_operand.vmem [shape: f32[8,32], index: 1, kind: output, shape index: {}]  }
   0x1   :  { %v82_v0 = vld [vmem:[%s146_s0 + $0x1c] sm:$0xf]  ;;  %v83_v1 = vld [vmem:[%s146_s0 + $0x18] sm:$0xf]  ;;  %v84_v2 = vld [vmem:[%s146_s0 + $0x14] sm:$0xf] }
   0x2   :  { %8 = vst [vmem:[#allocation0 + $0x38] sm:$0xf] %v82_v0  ;;  %13 = vst [vmem:[#allocation0 + $0x30] sm:$0xf] %v83_v1  ;;  %v85_v3 = vld [vmem:[%s146_s0 + $0x10] sm:$0xf] }
   0x3   :  { %18 = vst [vmem:[#allocation0 + $0x28] sm:$0xf] %v84_v2  ;;  %v86_v4 = vld [vmem:[%s146_s0 + $0xc] sm:$0xf]  ;;  %v87_v5 = vld [vmem:[%s146_s0 + $0x8] sm:$0xf] }
   0x4   :  { %23 = vst [vmem:[#allocation0 + $0x20] sm:$0xf] %v85_v3  ;;  %28 = vst [vmem:[#allocation0 + $0x18] sm:$0xf] %v86_v4  ;;  %v88_v6 = vld [vmem:[%s146_s0 + $0x4] sm:$0xf] }
   0x5   :  { %33 = vst [vmem:[#allocation0 + $0x10] sm:$0xf] %v87_v5  ;;  %v38_v7 = vld [vmem:[%s146_s0] sm:$0xf]  ;;  %37 = vst [vmem:[#allocation0 + $0x8] sm:$0xf] %v88_v6 }
   0x6   :  { %39 = vst [vmem:[#allocation0] sm:$0xf] %v38_v7  ;;  %s92_s0 = smov 24   ;;  %vm74_vm4 = vcmask 130112  }
   0xb   :  { %v49_v8 = vld [vmem:[#allocation0 + $0x3] ss:$8 sm:$0xf0]   ;;  %v59_v9 = vld [vmem:[#allocation0 + $0x2] ss:$8 sm:$0xf0]  }
   0xc   :  { %v69_v14 = vld [vmem:[#allocation0 + $0x1] ss:$8 sm:$0xf0]   ;;  %v41_v17 = vld [vmem:[#allocation0] ss:$8 sm:$0xf0]  }
   0xd   :  { %v47_v10 = vld [vmem:[#allocation0 + $0x3] ss:$8 sm:$0xf]   ;;  %v57_v11 = vld [vmem:[#allocation0 + $0x2] ss:$8 sm:$0xf]  }
   0xe   :  { %v51_v12 = vsel %vm42_vm0, %v49_v8, %v47_v10  ;;  %v67_v13 = vld [vmem:[#allocation0 + $0x1] ss:$8 sm:$0xf]   ;;  %v40_v16 = vld [vmem:[#allocation0] ss:$8 sm:$0xf]   ;;  %v61_v18 = vsel %vm42_vm0, %v59_v9, %v57_v11 }
   0xf   :  { %52 = vrot.lane.b32.xlu0 %v51_v12, %s92_s0  ;;  %v71_v15 = vsel %vm42_vm0, %v69_v14, %v67_v13  ;;  %v43_v19 = vsel %vm42_vm0, %v41_v17, %v40_v16 }
  0x10   :  { %72 = vrot.lane.b32.xlu1 %v71_v15, %s93_s22  ;;  %45 = vst.msk [vmem:[%s147_s1] sm:$0xff] %vm44_vm1, %v43_v19  }
  0x13   :  { %62 = vrot.lane.b32.xlu0 %v61_v18, %s94_s25 }
  0x81   :  { %v53_v20 = vpop.permute.xlu0 %52  }
  0x82   :  { %55 = vst.msk [vmem:[%s147_s1] sm:$0xff] %vm54_vm2, %v53_v20   ;;  %v73_v21 = vpop.permute.xlu1 %72  }
  0x85   :  { %v63_v22 = vpop.permute.xlu0 %62  }
  0x86   :  { %65 = vst.msk [vmem:[%s147_s1] sm:$0xff] %vm64_vm3, %v63_v22  }
  0x87   :  { %75 = vst.msk [vmem:[%s147_s1] sm:$0xff] %vm74_vm4, %v73_v21  }

// kernel: midi_model_base_forward.1
= control target key start
LH: loop header
LB: loop body
LE: loop exit
PB: predicated region body
PF: predicated region fallthrough
CT: control target
= control target key end

     0   :  { %s4097_s0 = inlined_call_operand.vmem [shape: s32[2,8,4], index: 0, kind: input, shape index: {}]   ;;  %s4098_s1 = inlined_call_operand.vmem [shape: bf16[64,32], index: 1, kind: input, shape index: {}]   ;;  %s4099_s2 = inlined_call_operand.vmem [shape: f32[8,32], index: 2, kind: input, shape index: {}]   ;;  %s4100_s3 = inlined_call_operand.vmem [shape: f32[8,32], index: 3, kind: input, shape index: {}]   ;;  %s4101_s4 = inlined_call_operand.vmem [shape: f32[32,32], index: 4, kind: input, shape index: {}]   ;;  %s4102_s5 = inlined_call_operand.vmem [shape: f32[1,32], index: 5, kind: input, shape index: {}]   ;;  %s4103_s6 = inlined_call_operand.vmem [shape: f32[2,1,32], index: 6, kind: input, shape index: {}]   ;;  %s4104_s7 = inlined_call_operand.vmem [shape: bf16[2,32,96], index: 7, kind: input, shape index: {}]   ;;  %s4105_s8 = inlined_call_operand.vmem [shape: bf16[2,32,32], index: 8, kind: input, shape index: {}]   ;;  %s4106_s9 = inlined_call_operand.vmem [shape: f32[2,1,32], index: 9, kind: input, shape index: {}]   ;;  %s4107_s10 = inlined_call_operand.vmem [shape: bf16[2,32,128], index: 10, kind: input, shape index: {}]   ;;  %s4108_s11 = inlined_call_operand.vmem [shape: bf16[2,64,32], index: 11, kind: input, shape index: {}]   ;;  %s4109_s12 = inlined_call_operand.vmem [shape: f32[2,2,4,32], index: 12, kind: input, shape index: {}]   ;;  %s4110_s13 = inlined_call_operand.vmem [shape: f32[2,2,4,32], index: 13, kind: input, shape index: {}]   ;;  %s4111_s14 = inlined_call_operand.hbm [shape: f32[2,8,32], index: 14, kind: output, shape index: {0}]   ;;  %s4112_s15 = inlined_call_operand.vmem [shape: f32[2,2,8,32], index: 15, kind: output, shape index: {1}]   ;;  %s4113_s16 = inlined_call_operand.vmem [shape: f32[2,2,8,32], index: 16, kind: output, shape index: {2}]  }
   0x1   :  { %4131 = sst [smem:[#allocation19_spill]] %s4097_s0 }
   0x2   :  { %4132 = sst [smem:[#allocation20_spill]] %s4098_s1 }
   0x3   :  { %4133 = sst [smem:[#allocation21_spill]] %s4099_s2 }
   0x4   :  { %4134 = sst [smem:[#allocation22_spill]] %s4100_s3 }
   0x5   :  { %4135 = sst [smem:[#allocation23_spill]] %s4101_s4 }
   0x6   :  { %4136 = sst [smem:[#allocation24_spill]] %s4102_s5 }
   0x7   :  { %4137 = sst [smem:[#allocation25_spill]] %s4104_s7 }
   0x8   :  { %4138 = sst [smem:[#allocation26_spill]] %s4105_s8 }
   0x9   :  { %4139 = sst [smem:[#allocation27_spill]] %s4111_s14 }
   0xa   :  { %22 = vsyncpa [#allocation4], 0 }
   0xb   :  { %24 = vsyncpa [#allocation4 + $0x1], 0  ;;  %s3571_s21 = smov 0   ;;  %s3573_s22 = smov 0  }
   0xc   :  { %s3575_s23 = smov 0   ;;  %s3577_s24 = smov 0  }
   0xd   :  { %s3579_s25 = smov 0   ;;  %s3581_s26 = smov 0  }
   0xe   :  { %s3583_s27 = smov 0   ;;  %s3585_s28 = smov 0  }
   0xf LB: > { %4140 = sst [smem:[#allocation6_spill]] %s3439_s21  ;;  %s2988_s29 = sadd.s32 4294967295, %s3467_s28   ;;  %s3467_s28 = sphi %s3585_s28, %s30_s28   ;;  %s3463_s27 = sphi %s3583_s27, %s4183_s27   ;;  %s3459_s26 = sphi %s3581_s26, %s4182_s26   ;;  %s3455_s25 = sphi %s3579_s25, %s4181_s25   ;;  %s3451_s24 = sphi %s3577_s24, %s4180_s24   ;;  %s3447_s23 = sphi %s3575_s23, %s4179_s23   ;;  %s3443_s22 = sphi %s3573_s22, %s4178_s22   ;;  %s3439_s21 = sphi %s3571_s21, %s4177_s21  }
  0x10   : > { %4141 = sst [smem:[#allocation7_spill]] %s3443_s22  ;;  %s2989_s30 = sadd.s32 4294967294, %s3467_s28  }
  0x11   : > { %4142 = sst [smem:[#allocation8_spill]] %s3447_s23  ;;  %s39_s0 = sadd.s32 1, %s3459_s26 }
  0x12   : > { %4143 = sst [smem:[#allocation9_spill]] %s3451_s24  ;;  %p40_p0 = scmp.ge.s32.totalorder %s39_s0, 2 }
  0x13   : > { %4144 = sst [smem:[#allocation10_spill]] %s3455_s25  ;;  %s42_s17 = sadd.s32 1, %s3463_s27 }
  0x14   : > { %4145 = sst [smem:[#allocation11_spill]] %s3459_s26  ;;  %p402_p1 = scmp.ne.s32.totalorder %s3447_s23, %s3443_s22 }
  0x15   : > { %4146 = sst [smem:[#allocation12_spill]] %s3463_s27  ;;  %p403_p2 = scmp.eq.s32.totalorder %s2988_s29, 3 }
  0x16   : > { %4147 = sst [smem:[#allocation13_spill]] %s3467_s28  ;;  %s4185_s0 = smov (%p40_p0, %s39_s0), 0 }
  0x17   : > { %4148 = sst [smem:[#allocation14_spill]] %s4185_s0  ;;  %s4187_s17 = smov (!%p40_p0, %s42_s17), %s3463_s27 }
  0x18   : > { %p3620_p3 = por %p403_p2, %p402_p1  ;;  %p408_p4 = scmp.ne.s32.totalorder %s3443_s22, %s3439_s21 }
  0x19   : > { %p44_p5 = scmp.ge.s32.totalorder %s4187_s17, 2  ;;  %p409_p6 = scmp.eq.s32.totalorder %s2989_s30, 3 }
  0x1a   : > { %s4149_s18 = scalar_select %p3620_p3, 1, 0 }
  0x1b   : > { %p2992_p7 = scmp.ge.s32.totalorder %s3467_s28, 1  ;;  %p571_p8 = scmp.lt.s32.totalorder %s3467_s28, 5 }
  0x1c   : > { %4150 = sst [smem:[#allocation15_spill]] %s4149_s18  ;;  %s4189_s17 = smov (%p44_p5, %s4187_s17), 0 }
  0x1d   : > { %4151 = sst [smem:[#allocation16_spill]] %s4189_s17  ;;  %p3630_p9 = por %p409_p6, %p408_p4 }
  0x1e   : > { %p572_p10 = pnand %p2992_p7, %p571_p8  ;;  %s389_s20 = ssub.s32 %s3463_s27, %s4189_s17 }
  0x1f   : > { %s4152_s19 = scalar_select %p3630_p9, 1, 0 }
  0x20   : > { %s392_s29 = sadd.s32 1, %s3447_s23  ;;  %p390_p11 = scmp.eq.s32.totalorder %s389_s20, 0 }
  0x21   : > { %4153 = sst [smem:[#allocation17_spill]] %s4152_s19  ;;  %575 = sbr.rel (%p572_p10) target bundleno = 3726 (0xe8e), region = 76 }
  0x22   : > { %s3638_s0 = scalar_select %p390_p11, %s3447_s23, %s392_s29  }
  0x23   : > { %s4125_s30 = sand.u32 (!%p572_p10), 1, %s3443_s22   ;;  %p678_p12 = scmp.lt.s32.totalorder (!%p572_p10), %s3455_s25, 1 }
  0x24   : > { %4154 = sst [smem:[#allocation18_spill]] %s3638_s0  ;;  %s2993_s26 = sshll.u32 (!%p572_p10), %s4125_s30, 3 }
  0x25   : > { %p682_p13 = scmp.lt.s32.totalorder (!%p572_p10), %s3451_s24, 1  ;;  %s4155_s27 = sld [smem:[#allocation19_spill]] (!%p572_p10) }
  0x26   : > { %s4156_s7 = sld [smem:[#allocation25_spill]] (!%p572_p10)  ;;  %s4157_s8 = sld [smem:[#allocation26_spill]] (!%p572_p10) }
  0x28   : > { %s679_s21 = scalar_select %p678_p12, %s3455_s25, 1 }
  0x29   : > { %s3647_s19 = scalar_select %p682_p13, %s3451_s24, 1 }
  0x2a   : > { %s2994_s20 = sshll.u32 %s679_s21, 3 }
  0x2b   : > { %s681_s0 = scalar_lea.vmem %s4155_s27, %s2994_s20  ;;  %s3067_s18 = sshll.u32 %s3647_s19, 4 }
  0x2c   : > { %s3664_s4 = scalar_lea.vmem %s4156_s7, %s3067_s18  ;;  %s3669_s24 = scalar_lea.vmem %s4157_s8, %s3067_s18 }
  0x2d   : > { %s3674_s23 = scalar_lea.vmem %s4107_s10, %s3067_s18  ;;  %s3070_s28 = sshll.u32 %s3647_s19, 5 }
  0x2e   : > { %s3680_s22 = scalar_lea.vmem %s4108_s11, %s3070_s28  ;;  %s3003_s30 = sshll.u32 %s3647_s19, 1 }
  0x2f   : > { %s713_s3 = sadd.s32 %s3003_s30, %s679_s21  ;;  %s3703_s30 = scalar_lea.vmem [#allocation3], %s2993_s26 }
  0x30   : > { %s3004_s5 = sshll.u32 %s713_s3, 2  ;;  %s3008_s25 = sshll.u32 %s713_s3, 3 }
  0x31   : > { %s3686_s1 = scalar_lea.vmem %s4109_s12, %s3004_s5  ;;  %s3691_s18 = scalar_lea.vmem %s4110_s13, %s3004_s5 }
  0x32   : > { %s3696_s20 = scalar_lea.vmem %s4112_s15, %s3008_s25  ;;  %s3701_s21 = scalar_lea.vmem %s4113_s16, %s3008_s25 }
  0x33   : > { %s4158_s7 = sld [smem:[#allocation9_spill]] }
  0x39   : > { %p3011_p0 = scmp.ne.s32.totalorder %s4158_s7, 0 }
  0x3a   : > { %v746_v0 = vlaneseq (!%p3011_p0)  ;;  %v3469_v1 = vmov (!%p3011_p0), 0.0   ;;  %v745_v3 = vld [vmem:[%s681_s0] sm:$0xff] (!%p3011_p0)  ;;  %s4159_s25 = sld [smem:[#allocation20_spill]] (!%p3011_p0)  ;;  %vm3470_vm0 = vmmov (!%p3011_p0), 0   ;;  %vm828_vm1 = vcmask (!%p3011_p0), 519168  }
  0x3b   : > { %744 = sbr.rel (%p3011_p0) target bundleno = 433 (0x1b1), region = 80  ;;  %3116 = vmatprep.subr.bf16.mxu0 (!%p3011_p0), %v3469_v1  ;;  %3124 = vmatprep.mubr.msk.bf16.mxu0 (!%p3011_p0), %vm3470_vm0, %v3469_v1  ;;  %vm917_vm10 = vcmask (!%p3011_p0), 1041409   ;;  %vm919_vm11 = vcmask (!%p3011_p0), 1042434   ;;  %vm921_vm12 = vcmask (!%p3011_p0), 1043459   ;;  %vm923_vm13 = vcmask (!%p3011_p0), 1044484  }
  0x3c   : > { %v749_v2 = vshrl.u32 (!%p3011_p0), %v746_v0, 7  ;;  %v747_v24 = vand.u32 (!%p3011_p0), 127, %v746_v0  ;;  %vm925_vm14 = vcmask (!%p3011_p0), 1045509   ;;  %vm927_vm15 = vcmask (!%p3011_p0), 1046534  }
  0x3d   : > { %vm929_vm0 = vcmask (!%p3011_p0), 1047559  }
  0x3e   : > { %v764_v4 = vsub.s32 (!%p3011_p0), 2, %v749_v2  ;;  %v750_v5 = vsub.s32 (!%p3011_p0), 0, %v749_v2  ;;  %v771_v6 = vsub.s32 (!%p3011_p0), 3, %v749_v2  ;;  %v757_v7 = vsub.s32 (!%p3011_p0), 1, %v749_v2 }
  0x3f   : > { %v785_v12 = vsub.s32 (!%p3011_p0), 5, %v749_v2  ;;  %v778_v13 = vsub.s32 (!%p3011_p0), 4, %v749_v2  ;;  %v799_v16 = vsub.s32 (!%p3011_p0), 7, %v749_v2  ;;  %v792_v17 = vsub.s32 (!%p3011_p0), 6, %v749_v2 }
  0x40   : > { %v765_v8 = vrot.slane (!%p3011_p0), %v745_v3, %v764_v4  ;;  %v751_v9 = vrot.slane (!%p3011_p0), %v745_v3, %v750_v5  ;;  %v772_v10 = vrot.slane (!%p3011_p0), %v745_v3, %v771_v6  ;;  %v758_v11 = vrot.slane (!%p3011_p0), %v745_v3, %v757_v7  ;;  %s4160_s0 = smov (!%p3011_p0), %s4159_s25  ;;  %v3333_v20 = vld [vmem:[%s4159_s25] sm:$0xff] (!%p3011_p0)  }
  0x41   : > { %v786_v14 = vrot.slane (!%p3011_p0), %v745_v3, %v785_v12  ;;  %v779_v15 = vrot.slane (!%p3011_p0), %v745_v3, %v778_v13  ;;  %v800_v18 = vrot.slane (!%p3011_p0), %v745_v3, %v799_v16  ;;  %v793_v19 = vrot.slane (!%p3011_p0), %v745_v3, %v792_v17  ;;  %3117 = vmatpush3.bf16.msra.mxu0 (!%p3011_p0), %v3333_v20  ;;  %v3334_v21 = vld [vmem:[%s4160_s0 + $0x8] sm:$0xff] (!%p3011_p0)   ;;  %v3335_v22 = vld [vmem:[%s4160_s0 + $0x10] sm:$0xff] (!%p3011_p0)   ;;  %v3336_v23 = vld [vmem:[%s4160_s0 + $0x18] sm:$0xff] (!%p3011_p0)  }
  0x42   : > { %767 = vbcast.lane.b32.xlu1 %v765_v8, 256  ;;  %753 = vbcast.lane.b32.xlu0 %v751_v9, 256 }
  0x43   : > { %3118 = vmatprep.subr.bf16.mxu0 %v3469_v1 }
  0x45   : > { %3119 = vmatpush3.bf16.msra.mxu0 %v3334_v21 }
  0x46   : > { %774 = vbcast.lane.b32.xlu1 %v772_v10, 256  ;;  %760 = vbcast.lane.b32.xlu0 %v758_v11, 256 }
  0x47   : > { %3120 = vmatprep.subr.bf16.mxu0 %v3469_v1 }
  0x49   : > { %3121 = vmatpush3.bf16.msra.mxu0 %v3335_v22 }
  0x4a   : > { %788 = vbcast.lane.b32.xlu1 %v786_v14, 256  ;;  %781 = vbcast.lane.b32.xlu0 %v779_v15, 256 }
  0x4b   : > { %3122 = vmatprep.subr.bf16.mxu0 %v3469_v1 }
  0x4d   : > { %3123 = vmatpush3.bf16.msra.mxu0 %v3336_v23 }
  0x4e   : > { %802 = vbcast.lane.b32.xlu1 %v800_v18, 256  ;;  %795 = vbcast.lane.b32.xlu0 %v793_v19, 256 }
  0xb4   : > { %v768_v25 = vpop.permute.xlu1 %767  ;;  %v754_v26 = vpop.permute.xlu0 %753 }
  0xb5   : > { %vm806_vm2 = vcmp.eq.s32.totalorder %v747_v24, %v768_v25  ;;  %vm804_vm3 = vcmp.eq.s32.totalorder %v747_v24, %v754_v26 }
  0xb6   : > { %v3014_v27 = vsel %vm806_vm2, 1.0, %v3469_v1  ;;  %v3012_v28 = vsel %vm804_vm3, 1.0, %v3469_v1  ;;  %vm1000_vm2 = vcmask 261120  }
  0xb7   : > { %v843_v29 = vsel %vm828_vm1, %v3014_v27, 0.0  ;;  %v829_v30 = vsel %vm828_vm1, %v3012_v28, 0.0 }
  0xb8   : > { %v844_v31 = vrot.slane %v843_v29, 4  ;;  %v830_v32 = vrot.slane %v829_v30, 4  ;;  %v775_v33 = vpop.permute.xlu1 %774  ;;  %v761_v34 = vpop.permute.xlu0 %760 }
  0xb9   : > { %vm807_vm4 = vcmp.eq.s32.totalorder %v747_v24, %v775_v33  ;;  %vm805_vm5 = vcmp.eq.s32.totalorder %v747_v24, %v761_v34 }
  0xba   : > { %v845_v35 = vadd.f32 %v844_v31, %v843_v29  ;;  %v831_v36 = vadd.f32 %v830_v32, %v829_v30  ;;  %v3015_v37 = vsel %vm807_vm4, 1.0, %v3469_v1  ;;  %v3013_v38 = vsel %vm805_vm5, 1.0, %v3469_v1 }
  0xbb   : > { %v850_v39 = vsel %vm828_vm1, %v3015_v37, 0.0  ;;  %v836_v40 = vsel %vm828_vm1, %v3013_v38, 0.0 }
  0xbc   : > { %v846_v41 = vrot.slane %v845_v35, 2  ;;  %v832_v42 = vrot.slane %v831_v36, 2  ;;  %v851_v43 = vrot.slane %v850_v39, 4  ;;  %v837_v44 = vrot.slane %v836_v40, 4  ;;  %v789_v45 = vpop.permute.xlu1 %788  ;;  %v782_v46 = vpop.permute.xlu0 %781 }
  0xbd   : > { %vm809_vm6 = vcmp.eq.s32.totalorder %v747_v24, %v789_v45  ;;  %vm808_vm7 = vcmp.eq.s32.totalorder %v747_v24, %v782_v46 }
  0xbe   : > { %v847_v47 = vadd.f32 %v846_v41, %v845_v35  ;;  %v833_v48 = vadd.f32 %v832_v42, %v831_v36  ;;  %v852_v49 = vadd.f32 %v851_v43, %v850_v39  ;;  %v838_v50 = vadd.f32 %v837_v44, %v836_v40 }
  0xbf   : > { %v3017_v51 = vsel %vm809_vm6, 1.0, %v3469_v1  ;;  %v3016_v52 = vsel %vm808_vm7, 1.0, %v3469_v1 }
  0xc0   : > { %v848_v53 = vrot.slane %v847_v47, 1  ;;  %v834_v54 = vrot.slane %v833_v48, 1  ;;  %v853_v55 = vrot.slane %v852_v49, 2  ;;  %v839_v56 = vrot.slane %v838_v50, 2  ;;  %v803_v57 = vpop.permute.xlu1 %802  ;;  %v796_v58 = vpop.permute.xlu0 %795 }
  0xc1   : > { %v864_v59 = vsel %vm828_vm1, %v3017_v51, 0.0  ;;  %v857_v60 = vsel %vm828_vm1, %v3016_v52, 0.0  ;;  %vm811_vm8 = vcmp.eq.s32.totalorder %v747_v24, %v803_v57  ;;  %vm810_vm9 = vcmp.eq.s32.totalorder %v747_v24, %v796_v58 }
  0xc2   : > { %v835_v61 = vadd.f32 %v834_v54, %v833_v48  ;;  %v854_v62 = vadd.f32 %v853_v55, %v852_v49  ;;  %v840_v63 = vadd.f32 %v839_v56, %v838_v50  ;;  %v865_v0 = vrot.slane %v864_v59, 4 }
  0xc3   : > { %v858_v2 = vrot.slane %v857_v60, 4  ;;  %v3019_v3 = vsel %vm811_vm8, 1.0, %v3469_v1  ;;  %v3018_v4 = vsel %vm810_vm9, 1.0, %v3469_v1  ;;  %v849_v5 = vadd.f32 %v848_v53, %v847_v47 }
  0xc4   : > { %v855_v6 = vrot.slane %v854_v62, 1  ;;  %v841_v7 = vrot.slane %v840_v63, 1  ;;  %v866_v8 = vadd.f32 %v865_v0, %v864_v59  ;;  %v878_v10 = vsel %vm828_vm1, %v3019_v3, 0.0 }
  0xc5   : > { %v859_v9 = vadd.f32 %v858_v2, %v857_v60  ;;  %v871_v11 = vsel %vm828_vm1, %v3018_v4, 0.0  ;;  %v885_v12 = vpack.c.bf16 %v835_v61, %v835_v61  ;;  %v879_v17 = vrot.slane %v878_v10, 4 }
  0xc6   : > { %v856_v13 = vadd.f32 %v855_v6, %v854_v62  ;;  %v842_v14 = vadd.f32 %v841_v7, %v840_v63  ;;  %v867_v15 = vrot.slane %v866_v8, 2  ;;  %v872_v18 = vrot.slane %v871_v11, 4 }
  0xc7   : > { %v860_v16 = vrot.slane %v859_v9, 2  ;;  %v887_v19 = vpack.c.bf16 %v849_v5, %v849_v5  ;;  %v880_v22 = vadd.f32 %v879_v17, %v878_v10  ;;  %v909_v24 = vunpack.c.l.b16 %v885_v12 }
  0xc8   : > { %v886_v20 = vpack.c.bf16 %v842_v14, %v842_v14  ;;  %v868_v1 = vadd.f32 %v867_v15, %v866_v8  ;;  %v873_v23 = vadd.f32 %v872_v18, %v871_v11  ;;  %v888_v25 = vpack.c.bf16 %v856_v13, %v856_v13 }
  0xc9   : > { %v861_v21 = vadd.f32 %v860_v16, %v859_v9  ;;  %v881_v29 = vrot.slane %v880_v22, 2  ;;  %v911_v31 = vunpack.c.l.b16 %v887_v19  ;;  %vm956_vm1 = vcmask 523264  }
  0xca   : > { %v910_v26 = vunpack.c.l.b16 %v886_v20  ;;  %v869_v27 = vrot.slane %v868_v1, 1  ;;  %v874_v30 = vrot.slane %v873_v23, 2  ;;  %v912_v38 = vunpack.c.l.b16 %v888_v25 }
  0xcb   : > { %v862_v28 = vrot.slane %v861_v21, 1  ;;  %v882_v35 = vadd.f32 %v881_v29, %v880_v22 }
  0xcc   : > { %v918_v32 = vsel %vm917_vm10, %v910_v26, %v909_v24  ;;  %v870_v33 = vadd.f32 %v869_v27, %v868_v1  ;;  %v875_v37 = vadd.f32 %v874_v30, %v873_v23 }
  0xcd   : > { %v863_v34 = vadd.f32 %v862_v28, %v861_v21  ;;  %v920_v36 = vsel %vm919_vm11, %v911_v31, %v918_v32  ;;  %v883_v41 = vrot.slane %v882_v35, 1 }
  0xce   : > { %v890_v39 = vpack.c.bf16 %v870_v33, %v870_v33  ;;  %v876_v42 = vrot.slane %v875_v37, 1  ;;  %v922_v43 = vsel %vm921_vm12, %v912_v38, %v920_v36 }
  0xcf   : > { %v889_v40 = vpack.c.bf16 %v863_v34, %v863_v34  ;;  %v884_v45 = vadd.f32 %v883_v41, %v882_v35 }
  0xd0   : > { %v877_v46 = vadd.f32 %v876_v42, %v875_v37  ;;  %v914_v47 = vunpack.c.l.b16 %v890_v39 }
  0xd1   : > { %v913_v44 = vunpack.c.l.b16 %v889_v40  ;;  %v892_v48 = vpack.c.bf16 %v884_v45, %v884_v45 }
  0xd2   : > { %v891_v50 = vpack.c.bf16 %v877_v46, %v877_v46 }
  0xd3   : > { %v924_v49 = vsel %vm923_vm13, %v913_v44, %v922_v43  ;;  %v916_v51 = vunpack.c.l.b16 %v892_v48 }
  0xd4   : > { %v915_v52 = vunpack.c.l.b16 %v891_v50  ;;  %v926_v53 = vsel %vm925_vm14, %v914_v47, %v924_v49 }
  0xd6   : > { %v928_v54 = vsel %vm927_vm15, %v915_v52, %v926_v53 }
  0xd7   : > { %v930_v55 = vsel %vm929_vm0, %v916_v51, %v928_v54 }
  0xd8   : > { %v931_v56 = vpack.c.b16 %v930_v55, %v930_v55 }
  0xda   : > { %3125 = vmatmul.mubr.msk.bf16.vlgmr.msra.gmra.mrb[0].mxu0 %vm956_vm1, %v931_v56 }
 0x1ad   : > { %v994_v57 = vpop.f32.mrb[0].mxu0 }
 0x1ae   : > { %1001 = vst.msk [vmem:[#allocation2] sm:$0xff] %vm1000_vm2, %v994_v57  ;;  %v3126_v58 = vpop.f32.mrb[1].mxu0 }
 0x1af   : > { %v997_v59 = vpop.f32.mrb[2].mxu0 }
 0x1b0   : > { %v3127_v60 = vpop.f32.mrb[3].mxu0 }
 0x1b1 PF: > { %vm1011_vm3 = vcmask 261120   ;;  %v3337_v0 = vld [vmem:[%s3664_s4] sm:$0xff]   ;;  %v3471_v2 = vmov 0.0   ;;  %vm3472_vm4 = vmmov 0   ;;  %v3338_v3 = vld [vmem:[%s3664_s4 + $0x8] sm:$0xff]   ;;  %s4161_s7 = sld [smem:[#allocation21_spill]]  ;;  %s4164_s8 = scalar_lea.vmem %s4103_s6, %s3647_s19  ;;  %v1286_v47 = vlaneseq }
 0x1b2   : > { %3128 = vmatprep.subr.bf16.mxu0 %v3471_v2  ;;  %3132 = vmatprep.mubr.msk.bf16.mxu0 %vm3472_vm4, %v3471_v2  ;;  %s4162_s25 = sld [smem:[#allocation23_spill]]  ;;  %s3473_s2 = smov 32   ;;  %v3474_v7 = vmov 0.0|0.0   ;;  %v3025_v16 = vld [vmem:[%s4164_s8] ss:$0 sm:$0xff]  ;;  %vm1262_vm5 = vcmask 1043456  }
 0x1b3   : > { %3129 = vmatpush3.bf16.msra.mxu0 %v3337_v0  ;;  %3144 = vmatprep.mubr.msk.f32.mxu1 %vm3472_vm4, %v3471_v2  ;;  %s3475_s14 = smov 96   ;;  %s4165_s5 = sld [smem:[#allocation22_spill]]  ;;  %v1257_v38 = vld [vmem:[%s3686_s1] sm:$0xf]  ;;  %v3479_v45 = vmov 1983009808  }
 0x1b4   : > { %3130 = vmatprep.subr.bf16.mxu0 %v3471_v2  ;;  %3234 = vmatprep.subr.bf16.mxu1 %v3474_v7  ;;  %s3476_s4 = smov 120   ;;  %s3477_s27 = smov 104   ;;  %v1284_v46 = vunpack.c.l.s4 %v3479_v45  ;;  %v3480_v48 = vmov 1934713408   ;;  %v3817_v53 = vshrl.u32 %v1286_v47, 7  ;;  %vm1871_vm6 = vcmask 64512  }
 0x1b5   : > { %v3739_v61 = vld [vmem:[#allocation2] sm:$0xff]  ;;  %v1316_v49 = vunpack.c.l.s4 %v3480_v48  ;;  %vm2068_vm8 = vcmask 97280   ;;  %s3481_s1 = smov 64   ;;  %vm2124_vm9 = vcmask 1045504   ;;  %s3484_s17 = smov 24   ;;  %vm2455_vm10 = vcmask 130048  }
 0x1b6   : > { %v1010_v62 = vmul.f32 %v3739_v61, %v3739_v61  ;;  %v1285_v52 = vunpack.c.0.s8 %v1284_v46  ;;  %vm2457_vm11 = vcmask 195584   ;;  %vm2640_vm12 = vcmask 523264  }
 0x1b7   : > { %3131 = vmatpush3.bf16.msra.mxu0 %v3338_v3  ;;  %v1003_v4 = vld [vmem:[%s4161_s7] sm:$0xff]  ;;  %v1317_v54 = vunpack.c.0.s8 %v1316_v49  ;;  %s4166_s7 = scalar_lea.vmem %s4106_s9, %s3647_s19  ;;  %s4167_s19 = sld [smem:[#allocation9_spill]] }
 0x1b8   : > { %v1012_v63 = vsel %vm1011_vm3, %v1010_v62, 0.0  ;;  %s4163_s3 = smov %s4162_s25  ;;  %v1005_v5 = vld [vmem:[%s4162_s25] sm:$0xff]  ;;  %1164 = vrot.lane.b32.xlu1 %v1003_v4, %s3473_s2  ;;  %3240 = vmatprep.subr.bf16.mxu0 %v3474_v7  ;;  %v3820_v58 = vsub.s32 %v1285_v52, %v3817_v53 }
 0x1b9   : > { %1013 = vadd.xlane.f32.xlu0 %v1012_v63  ;;  %v1006_v6 = vld [vmem:[%s4163_s3 + $0x8] sm:$0xff]  ;;  %v1007_v9 = vld [vmem:[%s4163_s3 + $0x10] sm:$0xff]  ;;  %v1008_v10 = vld [vmem:[%s4163_s3 + $0x18] sm:$0xff]  ;;  %v3823_v63 = vsub.s32 %v1317_v54, %v3817_v53 }
 0x1ba   : > { %v3235_v8 = vpack.c.bf16 %v1006_v6, %v1005_v5  ;;  %v3238_v11 = vpack.c.bf16 %v1008_v10, %v1007_v9  ;;  %v1004_v24 = vld [vmem:[%s4165_s5] sm:$0xff] }
 0x1bc   : > { %3236 = vmatpush3.bf16.msra.mxu1 %v3235_v8 }
 0x1bd   : > { %3237 = vmatprep.subr.bf16.mxu1 %v3474_v7  ;;  %p3061_p1 = scmp.ne.s32.totalorder %s4167_s19, 1 }
 0x1c0   : > { %3239 = vmatpush3.bf16.msra.mxu1 %v3238_v11 }
 0x1c1   : > { %3158 = vmatprep.subr.bf16.mxu1 %v3471_v2 }
 0x22a   : > { %v1165_v33 = vpop.permute.xlu1 %1164 }
 0x246   : > { %v1014_v12 = vpop.xlane.xlu0 %1013 }
 0x247   : > { %v1016_v13 = vmul.f32 0.03125, %v1014_v12 }
 0x249   : > { %v1017_v14 = vadd.f32 1e-06, %v1016_v13 }
 0x24b   : > { %3347 = vrsqrt.f32 %v1017_v14 }
 0x255   : > { %v3348_v15 = vpop.eup %3347 }
 0x256   : > { %v1019_v17 = vmul.f32 %v3348_v15, %v3739_v61 }
 0x258   : > { %v1026_v18 = vmul.f32 %v3025_v16, %v1019_v17 }
 0x25a   : > { %v1027_v19 = vpack.c.bf16 %v1026_v18, %v1026_v18 }
 0x25c   : > { %3133 = vmatmul.mubr.msk.bf16.vlgmr.msra.gmra.mrb[0].mxu0 %vm1011_vm3, %v1027_v19 }
 0x25d   : > { %3242 = vmatpush3.bf16.msra.mxu0 %v3235_v8  ;;  %3155 = vmatprep.mubr.msk.f32.mxu0 %vm3472_vm4, %v3471_v2 }
 0x25e   : > { %3243 = vmatprep.subr.bf16.mxu0 %v3474_v7 }
 0x261   : > { %3245 = vmatpush3.bf16.msra.mxu0 %v3238_v11 }
 0x262   : > { %3164 = vmatprep.subr.bf16.mxu0 %v3471_v2 }
 0x32f   : > { %v3779_v20 = vpop.f32.mrb[0].mxu0 }
 0x330   : > { %1168 = vrot.lane.b32.xlu0 %v3779_v20, %s3475_s14  ;;  %v3134_v1 = vpop.f32.mrb[1].mxu0  ;;  %3145 = vmatmul.mubr.msk.f32.vlgmr.msra.gmra.mrb[0].mxu1 %vm1011_vm3, %v3779_v20  ;;  %v1087_v26 = vmul.f32 %v3779_v20, %v1003_v4  ;;  %v1167_v34 = vmul.f32 %v1165_v33, %v3779_v20 }
 0x331   : > { %v1084_v21 = vpop.f32.mrb[2].mxu0  ;;  %3160 = vmatprep.mubr.msk.bf16.mxu1 %vm3472_vm4, %v3471_v2 }
 0x332   : > { %v3135_v22 = vpop.f32.mrb[3].mxu0 }
 0x3a2   : > { %v1169_v23 = vpop.permute.xlu0 %1168 }
 0x3a3   : > { %3156 = vmatmul.mubr.msk.f32.vlgmr.msra.gmra.mrb[4].mxu0 %vm1011_vm3, %v1169_v23 }
 0x3a4   : > { %3166 = vmatprep.mubr.msk.bf16.mxu0 %vm3472_vm4, %v3471_v2 }
 0x403   : > { %v1157_v25 = vpop.f32.mrb[0].mxu1 }
 0x404   : > { %v1161_v27 = vmul.f32 %v1157_v25, %v1004_v24  ;;  %v3146_v28 = vpop.f32.mrb[1].mxu1 }
 0x406   : > { %v1162_v29 = vadd.f32 %v1161_v27, %v1087_v26 }
 0x408   : > { %v3804_v41 = vmul.f32 0.35355338, %v1162_v29 }
 0x476   : > { %v1238_v30 = vpop.f32.mrb[4].mxu0 }
 0x477   : > { %v1242_v31 = vmul.f32 %v1238_v30, %v1004_v24  ;;  %v3157_v32 = vpop.f32.mrb[5].mxu0 }
 0x479   : > { %1244 = vrot.lane.b32.xlu1 %v1242_v31, %s3473_s2  ;;  %s3478_s2 = smov 112  }
 0x4eb   : > { %v1245_v35 = vpop.permute.xlu1 %1244 }
 0x4ec   : > { %v3796_v36 = vadd.f32 %v1245_v35, %v1167_v34 }
 0x4ee   : > { %v1258_v37 = vrot.slane %v3796_v36, 4 }
 0x4f0   : > { %1259 = vrot.lane.b32.xlu1 %v1258_v37, %s3475_s14 }
 0x562   : > { %v1260_v39 = vpop.permute.xlu1 %1259 }
 0x563   : > { %1420 = vrot.lane.b32.xlu1 %v1260_v39, %s3476_s4  ;;  %v1263_v40 = vsel %vm1262_vm5, %v1257_v38, %v1260_v39 }
 0x564   : > { %1430 = vrot.lane.b32.xlu0 %v1263_v40, %s3477_s27 }
 0x567   : > { %1426 = vrot.lane.b32.xlu1 %v1260_v39, %s3478_s2 }
 0x568   : > { %1272 = vrot.lane.b32.xlu0 %v3804_v41, %s3476_s4 }
 0x56b   : > { %1418 = vrot.lane.b32.xlu1 %v1263_v40, %s3476_s4 }
 0x56c   : > { %1278 = vrot.lane.b32.xlu0 %v3804_v41, %s3477_s27 }
 0x56f   : > { %1424 = vrot.lane.b32.xlu1 %v1263_v40, %s3478_s2 }
 0x573   : > { %1432 = vrot.lane.b32.xlu1 %v1260_v39, %s3477_s27 }
 0x577   : > { %1275 = vrot.lane.b32.xlu1 %v3804_v41, %s3478_s2 }
 0x5d5   : > { %v1421_v42 = vpop.permute.xlu1 %1420 }
 0x5d6   : > { %v1431_v43 = vpop.permute.xlu0 %1430 }
 0x5d9   : > { %v1427_v44 = vpop.permute.xlu1 %1426 }
 0x5da   : > { %v1273_v50 = vpop.permute.xlu0 %1272  ;;  %v1504_v6 = vcombine.low %v1260_v39, %v1427_v44 }
 0x5dc   : > { %v1511_v18 = vrot.slane %v1504_v6, %v3820_v58 }
 0x5dd   : > { %v1419_v51 = vpop.permute.xlu1 %1418 }
 0x5de   : > { %v1452_v55 = vcombine.low %v1419_v51, %v1431_v43  ;;  %v1453_v56 = vcombine.high %v1419_v51, %v1431_v43  ;;  %v1279_v59 = vpop.permute.xlu0 %1278 }
 0x5df   : > { %v1297_v7 = vcombine.low %v1273_v50, %v1279_v59  ;;  %v1298_v19 = vcombine.high %v1273_v50, %v1279_v59 }
 0x5e0   : > { %v1460_v0 = vrot.slane %v1452_v55, %v3820_v58  ;;  %v1467_v3 = vrot.slane %v1453_v56, %v3820_v58 }
 0x5e1   : > { %v1425_v57 = vpop.permute.xlu1 %1424  ;;  %v1305_v1 = vrot.slane %v1297_v7, %v3820_v58 }
 0x5e2   : > { %v1436_v60 = vcombine.low %v1263_v40, %v1425_v57  ;;  %v1437_v62 = vcombine.high %v1263_v40, %v1425_v57  ;;  %v1312_v40 = vrot.slane %v1298_v19, %v3820_v58 }
 0x5e4   : > { %v1444_v4 = vrot.slane %v1436_v60, %v3820_v58  ;;  %v1451_v5 = vrot.slane %v1437_v62, %v3820_v58 }
 0x5e5   : > { %v1433_v8 = vpop.permute.xlu1 %1432 }
 0x5e6   : > { %v1468_v9 = vcombine.low %v1444_v4, %v1460_v0  ;;  %v1469_v10 = vcombine.high %v1444_v4, %v1460_v0  ;;  %v1484_v11 = vcombine.low %v1451_v5, %v1467_v3  ;;  %v1485_v12 = vcombine.high %v1451_v5, %v1467_v3 }
 0x5e7   : > { %v1512_v13 = vcombine.low %v1421_v42, %v1433_v8 }
 0x5e8   : > { %v1476_v14 = vrot.slane %v1468_v9, %v3823_v63  ;;  %v1483_v15 = vrot.slane %v1469_v10, %v3823_v63  ;;  %v1492_v16 = vrot.slane %v1484_v11, %v3823_v63  ;;  %v1499_v17 = vrot.slane %v1485_v12, %v3823_v63 }
 0x5e9   : > { %v1519_v21 = vrot.slane %v1512_v13, %v3820_v58  ;;  %v1276_v22 = vpop.permute.xlu1 %1275 }
 0x5ea   : > { %v1538_v23 = vcombine.low %v1476_v14, %v1483_v15  ;;  %v3033_v24 = vcombine.high %v1476_v14, %v1483_v15  ;;  %v1554_v25 = vcombine.low %v1492_v16, %v1499_v17  ;;  %v3034_v26 = vcombine.high %v1492_v16, %v1499_v17 }
 0x5eb   : > { %v1520_v27 = vcombine.low %v1511_v18, %v1519_v21  ;;  %v1521_v28 = vcombine.high %v1511_v18, %v1519_v21  ;;  %v1281_v29 = vcombine.low %v3804_v41, %v1276_v22  ;;  %v1282_v30 = vcombine.high %v3804_v41, %v1276_v22 }
 0x5ec   : > { %v1545_v31 = vrot.slane %v1538_v23, %v3820_v58  ;;  %v1553_v32 = vrot.slane %v3033_v24, %v3820_v58  ;;  %v1561_v33 = vrot.slane %v1554_v25, %v3820_v58  ;;  %v1569_v34 = vrot.slane %v3034_v26, %v3820_v58 }
 0x5ed   : > { %v1528_v35 = vrot.slane %v1520_v27, %v3823_v63  ;;  %v1535_v37 = vrot.slane %v1521_v28, %v3823_v63  ;;  %v1289_v38 = vrot.slane %v1281_v29, %v3820_v58  ;;  %v1296_v39 = vrot.slane %v1282_v30, %v3820_v58 }
 0x5ee   : > { %v1570_v42 = vcombine.low %v1545_v31, %v1553_v32  ;;  %v1586_v41 = vcombine.low %v1561_v33, %v1569_v34  ;;  %v1571_v60 = vcombine.high %v1545_v31, %v1553_v32  ;;  %v1587_v62 = vcombine.high %v1561_v33, %v1569_v34 }
 0x5ef   : > { %v1606_v43 = vcombine.low %v1528_v35, %v1535_v37  ;;  %v3035_v44 = vcombine.high %v1528_v35, %v1535_v37  ;;  %v1313_v45 = vcombine.low %v1289_v38, %v1305_v1  ;;  %v1314_v46 = vcombine.high %v1289_v38, %v1305_v1 }
 0x5f0   : > { %v1329_v48 = vcombine.low %v1296_v39, %v1312_v40  ;;  %v1330_v49 = vcombine.high %v1296_v39, %v1312_v40  ;;  %v1578_v50 = vrot.slane %v1570_v42, %v3823_v63  ;;  %v1594_v51 = vrot.slane %v1586_v41, %v3823_v63 }
 0x5f1   : > { %v1613_v52 = vrot.slane %v1606_v43, %v3820_v58  ;;  %v1621_v54 = vrot.slane %v3035_v44, %v3820_v58  ;;  %v1321_v55 = vrot.slane %v1313_v45, %v3823_v63  ;;  %v1328_v56 = vrot.slane %v1314_v46, %v3823_v63 }
 0x5f2   : > { %v1337_v57 = vrot.slane %v1329_v48, %v3823_v63  ;;  %v1344_v59 = vrot.slane %v1330_v49, %v3823_v63  ;;  %v1602_v7 = vcombine.low %v1578_v50, %v1594_v51  ;;  %v1603_v12 = vcombine.high %v1578_v50, %v1594_v51 }
 0x5f3   : > { %v1349_v0 = vcombine.low %v1321_v55, %v1328_v56  ;;  %v3031_v3 = vcombine.high %v1321_v55, %v1328_v56  ;;  %v1622_v4 = vcombine.low %v1613_v52, %v1621_v54  ;;  %v1623_v8 = vcombine.high %v1613_v52, %v1621_v54 }
 0x5f4   : > { %v1365_v5 = vcombine.low %v1337_v57, %v1344_v59  ;;  %v3032_v6 = vcombine.high %v1337_v57, %v1344_v59  ;;  %v1585_v15 = vrot.slane %v1571_v60, %v3823_v63  ;;  %v1601_v16 = vrot.slane %v1587_v62, %v3823_v63 }
 0x5f5   : > { %v1356_v9 = vrot.slane %v1349_v0, %v3820_v58  ;;  %v1364_v10 = vrot.slane %v3031_v3, %v3820_v58  ;;  %v1630_v11 = vrot.slane %v1622_v4, %v3823_v63  ;;  %v1637_v1 = vrot.slane %v1623_v8, %v3823_v63 }
 0x5f6   : > { %v1372_v13 = vrot.slane %v1365_v5, %v3820_v58  ;;  %v1380_v14 = vrot.slane %v3032_v6, %v3820_v58  ;;  %v1604_v26 = vcombine.low %v1585_v15, %v1601_v16  ;;  %v1605_v34 = vcombine.high %v1585_v15, %v1601_v16  ;;  %v1264_v16 = vld [vmem:[%s3691_s18] sm:$0xf]  ;;  %s3483_s18 = smov 8  }
 0x5f7   : > { %v1381_v17 = vcombine.low %v1356_v9, %v1364_v10  ;;  %v1867_v18 = vpack.c.bf16 %v1630_v11, %v1602_v7  ;;  %v1638_v19 = vcombine.high %v1630_v11, %v3471_v2  ;;  %v1382_v27 = vcombine.high %v1356_v9, %v1364_v10 }
 0x5f8   : > { %v1397_v21 = vcombine.low %v1372_v13, %v1380_v14  ;;  %v1398_v28 = vcombine.high %v1372_v13, %v1380_v14  ;;  %v1639_v30 = vcombine.high %v1637_v1, %v3471_v2  ;;  %v1869_v32 = vpack.c.bf16 %v1637_v1, %v1604_v26 }
 0x5f9   : > { %v1876_v22 = vsel %vm1871_vm6, %v1867_v18, 0  ;;  %v1868_v23 = vpack.c.bf16 %v1638_v19, %v1603_v12  ;;  %v1389_v24 = vrot.slane %v1381_v17, %v3823_v63  ;;  %v1396_v38 = vrot.slane %v1382_v27, %v3823_v63 }
 0x5fa   : > { %3159 = vmatpush3.bf16.xpose.msra.mxu1 %v1876_v22  ;;  %v1405_v25 = vrot.slane %v1397_v21, %v3823_v63  ;;  %v1870_v37 = vpack.c.bf16 %v1639_v30, %v1605_v34  ;;  %v1412_v39 = vrot.slane %v1398_v28, %v3823_v63  ;;  %v1968_v40 = vsel %vm1871_vm6, %v1869_v32, 0 }
 0x5fb   : > { %v1922_v29 = vsel %vm1871_vm6, %v1868_v23, 0  ;;  %3170 = vmatprep.subr.bf16.mxu1 %v3471_v2  ;;  %v2057_v48 = vand.u32 127, %v1286_v47  ;;  %v2060_v49 = vadd.s32 4, %v3817_v53  ;;  %v1265_v13 = vrot.slane %v3779_v20, 4 }
 0x5fc   : > { %3165 = vmatpush3.bf16.xpose.msra.mxu0 %v1922_v29  ;;  %v1413_v31 = vcombine.low %v1389_v24, %v1405_v25  ;;  %v1414_v33 = vcombine.high %v1389_v24, %v1405_v25  ;;  %v2014_v41 = vsel %vm1871_vm6, %v1870_v37, 0  ;;  %v1415_v43 = vcombine.low %v1396_v38, %v1412_v39 }
 0x5fd   : > { %3176 = vmatprep.subr.bf16.mxu0 %v3471_v2  ;;  %v1416_v44 = vcombine.high %v1396_v38, %v1412_v39  ;;  %vm2061_vm7 = vcmp.le.s32.totalorder %v2057_v48, %v2060_v49 }
 0x5fe   : > { %v1863_v35 = vpack.c.bf16 %v1413_v31, %v1413_v31  ;;  %v1864_v42 = vpack.c.bf16 %v1414_v33, %v1414_v33  ;;  %v1865_v45 = vpack.c.bf16 %v1415_v43, %v1415_v43 }
 0x5ff   : > { %v1866_v46 = vpack.c.bf16 %v1416_v44, %v1416_v44 }
 0x601   : > { %3161 = vmatmul.mubr.msk.bf16.vlgmr.msra.gmra.mrb[4].mxu1 %vm1871_vm6, %v1863_v35 }
 0x602   : > { %3171 = vmatpush3.bf16.xpose.msra.mxu1 %v1968_v40  ;;  %3172 = vmatprep.mubr.msk.bf16.mxu1 %vm3472_vm4, %v3471_v2 }
 0x603   : > { %3167 = vmatmul.mubr.msk.bf16.vlgmr.msra.gmra.mrb[8].mxu0 %vm1871_vm6, %v1864_v42  ;;  %3182 = vmatprep.subr.bf16.mxu1 %v3471_v2 }
 0x604   : > { %3177 = vmatpush3.bf16.xpose.msra.mxu0 %v2014_v41  ;;  %3178 = vmatprep.mubr.msk.bf16.mxu0 %vm3472_vm4, %v3471_v2 }
 0x605   : > { %3188 = vmatprep.subr.bf16.mxu0 %v3471_v2 }
 0x609   : > { %3173 = vmatmul.mubr.msk.bf16.vlgmr.msra.gmra.mrb[8].mxu1 %vm1871_vm6, %v1865_v45 }
 0x60a   : > { %3184 = vmatprep.mubr.msk.bf16.mxu1 %vm3472_vm4, %v3471_v2 }
 0x60b   : > { %3179 = vmatmul.mubr.msk.bf16.vlgmr.msra.gmra.mrb[12].mxu0 %vm1871_vm6, %v1866_v46 }
 0x60c   : > { %3190 = vmatprep.mubr.msk.bf16.mxu0 %vm3472_vm4, %v3471_v2 }
 0x6d4   : > { %v1912_v50 = vpop.f32.mrb[4].mxu1 }
 0x6d5   : > { %v2064_v51 = vsel %vm2061_vm7, %v1912_v50, -1e+30  ;;  %v3162_v52 = vpop.f32.mrb[5].mxu1 }
 0x6d6   : > { %v1915_v54 = vpop.f32.mrb[6].mxu1  ;;  %v1958_v55 = vpop.f32.mrb[8].mxu0  ;;  %v2069_v56 = vsel %vm2068_vm8, %v2064_v51, -inf }
 0x6d7   : > { %v2065_v57 = vsel %vm2061_vm7, %v1958_v55, -1e+30  ;;  %2070 = vmax.xlane.f32.xlu1 %v2069_v56  ;;  %v3163_v59 = vpop.f32.mrb[7].mxu1  ;;  %v3168_v60 = vpop.f32.mrb[9].mxu0 }
 0x6d8   : > { %v1961_v62 = vpop.f32.mrb[10].mxu0  ;;  %v2072_v47 = vsel %vm2068_vm8, %v2065_v57, -inf }
 0x6d9   : > { %2073 = vmax.xlane.f32.xlu0 %v2072_v47  ;;  %v3169_v53 = vpop.f32.mrb[11].mxu0 }
 0x6dc   : > { %v2004_v0 = vpop.f32.mrb[8].mxu1 }
 0x6dd   : > { %v2066_v3 = vsel %vm2061_vm7, %v2004_v0, -1e+30  ;;  %v3174_v4 = vpop.f32.mrb[9].mxu1 }
 0x6de   : > { %v2007_v5 = vpop.f32.mrb[10].mxu1  ;;  %v2050_v6 = vpop.f32.mrb[12].mxu0  ;;  %v2075_v7 = vsel %vm2068_vm8, %v2066_v3, -inf }
 0x6df   : > { %v2067_v8 = vsel %vm2061_vm7, %v2050_v6, -1e+30  ;;  %v3175_v9 = vpop.f32.mrb[11].mxu1  ;;  %2076 = vmax.xlane.f32.xlu0 %v2075_v7  ;;  %v3180_v10 = vpop.f32.mrb[13].mxu0 }
 0x6e0   : > { %v2053_v11 = vpop.f32.mrb[14].mxu0  ;;  %v2078_v22 = vsel %vm2068_vm8, %v2067_v8, -inf }
 0x6e1   : > { %v3181_v12 = vpop.f32.mrb[15].mxu0 }
 0x6f5   : > { %1266 = vrot.lane.b32.xlu0 %v1265_v13, %s3481_s1 }
 0x764   : > { %v2071_v24 = vpop.xlane.xlu1 %2070 }
 0x765   : > { %v2081_v25 = vsub.f32 %v2064_v51, %v2071_v24 }
 0x766   : > { %v2074_v14 = vpop.xlane.xlu0 %2073 }
 0x767   : > { %v2085_v26 = vmul.f32 1.442695, %v2081_v25  ;;  %v2082_v27 = vsub.f32 %v2065_v57, %v2074_v14 }
 0x769   : > { %v2087_v28 = vmul.f32 1.442695, %v2082_v27 }
 0x76c   : > { %v2077_v15 = vpop.xlane.xlu0 %2076 }
 0x76d   : > { %v2083_v19 = vsub.f32 %v2066_v3, %v2077_v15 }
 0x76f   : > { %v2089_v1 = vmul.f32 1.442695, %v2083_v19 }
 0x770   : > { %v3901_v17 = vpop.permute.xlu0 %1266 }
 0x771   : > { %1643 = vrot.lane.b32.xlu0 %v3901_v17, %s3476_s4  ;;  %v1269_v18 = vsel %vm1262_vm5, %v1264_v16, %v3901_v17  ;;  %3349 = vpow2.f32 %v2089_v1 }
 0x772   : > { %1641 = vrot.lane.b32.xlu1 %v1269_v18, %s3476_s4  ;;  %3351 = vpow2.f32 %v2085_v26 }
 0x773   : > { %3353 = vpow2.f32 %v2087_v28 }
 0x775   : > { %1647 = vrot.lane.b32.xlu0 %v1269_v18, %s3478_s2 }
 0x779   : > { %1653 = vrot.lane.b32.xlu0 %v1269_v18, %s3477_s27 }
 0x77b   : > { %v3910_v21 = vpop.eup %3349 }
 0x77c   : > { %v2099_v23 = vsel %vm2068_vm8, %v3910_v21, 0.0  ;;  %v3917_v29 = vpop.eup %3351 }
 0x77d   : > { %v2093_v30 = vsel %vm2068_vm8, %v3917_v29, 0.0  ;;  %v3921_v31 = vpop.eup %3353 }
 0x77e   : > { %v2096_v32 = vsel %vm2068_vm8, %v3921_v31, 0.0 }
 0x796   : > { %2079 = vmax.xlane.f32.xlu1 %v2078_v22 }
 0x798   : > { %2100 = vadd.xlane.f32.xlu0 %v2099_v23 }
 0x7a7   : > { %1649 = vrot.lane.b32.xlu1 %v3901_v17, %s3478_s2 }
 0x7cb   : > { %2094 = vadd.xlane.f32.xlu1 %v2093_v30 }
 0x7cf   : > { %2097 = vadd.xlane.f32.xlu1 %v2096_v32 }
 0x7e0   : > { %1655 = vrot.lane.b32.xlu1 %v3901_v17, %s3477_s27 }
 0x7e3   : > { %v1644_v40 = vpop.permute.xlu0 %1643 }
 0x7e4   : > { %v1642_v33 = vpop.permute.xlu1 %1641 }
 0x7e7   : > { %v1648_v42 = vpop.permute.xlu0 %1647 }
 0x7e8   : > { %v1659_v45 = vcombine.low %v1269_v18, %v1648_v42  ;;  %v1660_v46 = vcombine.high %v1269_v18, %v1648_v42 }
 0x7ea   : > { %v1667_v50 = vrot.slane %v1659_v45, %v3820_v58  ;;  %v1674_v52 = vrot.slane %v1660_v46, %v3820_v58 }
 0x7eb   : > { %v1654_v41 = vpop.permute.xlu0 %1653 }
 0x7ec   : > { %v1675_v43 = vcombine.low %v1642_v33, %v1654_v41  ;;  %v1676_v44 = vcombine.high %v1642_v33, %v1654_v41 }
 0x7ee   : > { %v1683_v48 = vrot.slane %v1675_v43, %v3820_v58  ;;  %v1690_v49 = vrot.slane %v1676_v44, %v3820_v58 }
 0x7f0   : > { %v1691_v54 = vcombine.low %v1667_v50, %v1683_v48  ;;  %v1692_v55 = vcombine.high %v1667_v50, %v1683_v48  ;;  %v1707_v56 = vcombine.low %v1674_v52, %v1690_v49  ;;  %v1708_v57 = vcombine.high %v1674_v52, %v1690_v49 }
 0x7f2   : > { %v1699_v60 = vrot.slane %v1691_v54, %v3823_v63  ;;  %v1706_v62 = vrot.slane %v1692_v55, %v3823_v63  ;;  %v1715_v47 = vrot.slane %v1707_v56, %v3823_v63  ;;  %v1722_v53 = vrot.slane %v1708_v57, %v3823_v63 }
 0x7f4   : > { %v1761_v3 = vcombine.low %v1699_v60, %v1706_v62  ;;  %v3036_v4 = vcombine.high %v1699_v60, %v1706_v62  ;;  %v1777_v5 = vcombine.low %v1715_v47, %v1722_v53  ;;  %v3037_v6 = vcombine.high %v1715_v47, %v1722_v53 }
 0x7f6   : > { %v1768_v10 = vrot.slane %v1761_v3, %v3820_v58  ;;  %v1776_v11 = vrot.slane %v3036_v4, %v3820_v58  ;;  %v1784_v12 = vrot.slane %v1777_v5, %v3820_v58  ;;  %v1792_v13 = vrot.slane %v3037_v6, %v3820_v58 }
 0x7f8   : > { %v1793_v1 = vcombine.low %v1768_v10, %v1776_v11  ;;  %v1809_v22 = vcombine.low %v1784_v12, %v1792_v13  ;;  %v1794_v23 = vcombine.high %v1768_v10, %v1776_v11  ;;  %v1810_v24 = vcombine.high %v1784_v12, %v1792_v13 }
 0x7fa   : > { %v1801_v32 = vrot.slane %v1793_v1, %v3823_v63  ;;  %v1817_v33 = vrot.slane %v1809_v22, %v3823_v63 }
 0x7fc   : > { %v1825_v42 = vcombine.low %v1801_v32, %v1817_v33  ;;  %v1826_v45 = vcombine.high %v1801_v32, %v1817_v33 }
 0x823   : > { %v2080_v34 = vpop.xlane.xlu1 %2079 }
 0x824   : > { %v2084_v35 = vsub.f32 %v2067_v8, %v2080_v34  ;;  %v1808_v34 = vrot.slane %v1794_v23, %v3823_v63 }
 0x825   : > { %v2101_v25 = vpop.xlane.xlu0 %2100 }
 0x826   : > { %v2091_v37 = vmul.f32 1.442695, %v2084_v35  ;;  %v1824_v35 = vrot.slane %v1810_v24, %v3823_v63 }
 0x827   : > { %v1650_v51 = vpop.permute.xlu1 %1649 }
 0x828   : > { %3355 = vpow2.f32 %v2091_v37  ;;  %v1727_v7 = vcombine.low %v3901_v17, %v1650_v51  ;;  %v1827_v46 = vcombine.low %v1808_v34, %v1824_v35  ;;  %v1828_v52 = vcombine.high %v1808_v34, %v1824_v35 }
 0x82a   : > { %v1734_v14 = vrot.slane %v1727_v7, %v3820_v58 }
 0x832   : > { %v3927_v38 = vpop.eup %3355 }
 0x833   : > { %v2102_v39 = vsel %vm2068_vm8, %v3927_v38, 0.0 }
 0x834   : > { %2103 = vadd.xlane.f32.xlu1 %v2102_v39 }
 0x858   : > { %v2095_v59 = vpop.xlane.xlu1 %2094 }
 0x859   : > { %3357 = vrcp.f32 %v2095_v59 }
 0x85c   : > { %v2098_v0 = vpop.xlane.xlu1 %2097 }
 0x85d   : > { %3359 = vrcp.f32 %v2098_v0 }
 0x85e   : > { %3361 = vrcp.f32 %v2101_v25 }
 0x860   : > { %v1656_v8 = vpop.permute.xlu1 %1655 }
 0x861   : > { %v1735_v9 = vcombine.low %v1644_v40, %v1656_v8 }
 0x863   : > { %v1742_v15 = vrot.slane %v1735_v9, %v3820_v58  ;;  %v3358_v40 = vpop.eup %3357 }
 0x864   : > { %v2109_v48 = vmul.f32 %v3358_v40, %v3917_v29 }
 0x865   : > { %v1743_v16 = vcombine.low %v1734_v14, %v1742_v15  ;;  %v1744_v18 = vcombine.high %v1734_v14, %v1742_v15 }
 0x866   : > { %v2113_v60 = vpack.c.bf16 %v2109_v48, %v2109_v48 }
 0x867   : > { %v1751_v17 = vrot.slane %v1743_v16, %v3823_v63  ;;  %v1758_v19 = vrot.slane %v1744_v18, %v3823_v63  ;;  %v3360_v44 = vpop.eup %3359 }
 0x868   : > { %v2110_v54 = vmul.f32 %v3360_v44, %v3921_v31  ;;  %v3362_v29 = vpop.eup %3361 }
 0x869   : > { %v1829_v26 = vcombine.low %v1751_v17, %v1758_v19  ;;  %v3038_v27 = vcombine.high %v1751_v17, %v1758_v19  ;;  %v2111_v31 = vmul.f32 %v3362_v29, %v3910_v21 }
 0x86a   : > { %v2114_v53 = vpack.c.bf16 %v2110_v54, %v2110_v54  ;;  %v3340_v54 = vld [vmem:[%s3669_s24 + $0x8] sm:$0xff]  }
 0x86b   : > { %v1836_v28 = vrot.slane %v1829_v26, %v3820_v58  ;;  %v1844_v30 = vrot.slane %v3038_v27, %v3820_v58  ;;  %v2115_v3 = vpack.c.bf16 %v2111_v31, %v2111_v31 }
 0x86d   : > { %v1845_v37 = vcombine.low %v1836_v28, %v1844_v30  ;;  %v1846_v39 = vcombine.high %v1836_v28, %v1844_v30 }
 0x86f   : > { %v1853_v41 = vrot.slane %v1845_v37, %v3823_v63  ;;  %v1860_v43 = vrot.slane %v1846_v39, %v3823_v63  ;;  %v3339_v39 = vld [vmem:[%s3669_s24] sm:$0xff]   ;;  %s3482_s24 = smov 16  }
 0x871   : > { %v2117_v49 = vpack.c.bf16 %v1853_v41, %v1825_v42  ;;  %v1861_v50 = vcombine.high %v1853_v41, %v3471_v2  ;;  %v1862_v51 = vcombine.high %v1860_v43, %v3471_v2  ;;  %v2119_v57 = vpack.c.bf16 %v1860_v43, %v1827_v46 }
 0x873   : > { %v2126_v55 = vsel %vm2124_vm9, %v2117_v49, 0  ;;  %v2118_v56 = vpack.c.bf16 %v1861_v50, %v1826_v45  ;;  %v2120_v62 = vpack.c.bf16 %v1862_v51, %v1828_v52  ;;  %v2218_v47 = vsel %vm2124_vm9, %v2119_v57, 0 }
 0x874   : > { %3183 = vmatpush3.bf16.msra.mxu1 %v2126_v55 }
 0x875   : > { %v2172_v59 = vsel %vm2124_vm9, %v2118_v56, 0  ;;  %3194 = vmatprep.subr.bf16.mxu1 %v3471_v2  ;;  %v2264_v0 = vsel %vm2124_vm9, %v2120_v62, 0 }
 0x876   : > { %3189 = vmatpush3.bf16.msra.mxu0 %v2172_v59 }
 0x877   : > { %3185 = vmatmul.mubr.msk.bf16.vlgmr.msra.gmra.mrb[12].mxu1 %vm2068_vm8, %v2113_v60  ;;  %3200 = vmatprep.subr.bf16.mxu0 %v3471_v2 }
 0x878   : > { %3195 = vmatpush3.bf16.msra.mxu1 %v2218_v47  ;;  %3196 = vmatprep.mubr.msk.bf16.mxu1 %vm3472_vm4, %v3471_v2 }
 0x879   : > { %3191 = vmatmul.mubr.msk.bf16.vlgmr.msra.gmra.mrb[16].mxu0 %vm2068_vm8, %v2114_v53  ;;  %3206 = vmatprep.subr.bf16.mxu1 %v3471_v2 }
 0x87a   : > { %3201 = vmatpush3.bf16.msra.mxu0 %v2264_v0  ;;  %3202 = vmatprep.mubr.msk.bf16.mxu0 %vm3472_vm4, %v3471_v2 }
 0x87b   : > { %3214 = vmatprep.subr.bf16.mxu0 %v3471_v2 }
 0x87f   : > { %3197 = vmatmul.mubr.msk.bf16.vlgmr.msra.gmra.mrb[16].mxu1 %vm2068_vm8, %v2115_v3 }
 0x880   : > { %3210 = vmatprep.mubr.msk.bf16.mxu1 %vm3472_vm4, %v3471_v2  ;;  %3207 = vmatpush3.bf16.msra.mxu1 %v3339_v39 }
 0x881   : > { %3208 = vmatprep.subr.bf16.mxu1 %v3471_v2 }
 0x884   : > { %3209 = vmatpush3.bf16.msra.mxu1 %v3340_v54 }
 0x885   : > { %3222 = vmatprep.subr.bf16.mxu1 %v3471_v2 }
 0x8c1   : > { %v2104_v4 = vpop.xlane.xlu1 %2103 }
 0x8c2   : > { %3363 = vrcp.f32 %v2104_v4 }
 0x8cc   : > { %v3364_v21 = vpop.eup %3363 }
 0x8cd   : > { %v2112_v5 = vmul.f32 %v3364_v21, %v3927_v38 }
 0x8cf   : > { %v2116_v6 = vpack.c.bf16 %v2112_v5, %v2112_v5 }
 0x8d1   : > { %3203 = vmatmul.mubr.msk.bf16.vlgmr.msra.gmra.mrb[20].mxu0 %vm2068_vm8, %v2116_v6 }
 0x8d2   : > { %3218 = vmatprep.mubr.msk.bf16.mxu0 %vm3472_vm4, %v3471_v2 }
 0x94a   : > { %v2162_v7 = vpop.f32.mrb[12].mxu1 }
 0x94b   : > { %v3186_v8 = vpop.f32.mrb[13].mxu1 }
 0x94c   : > { %v2165_v9 = vpop.f32.mrb[14].mxu1  ;;  %v2208_v10 = vpop.f32.mrb[16].mxu0 }
 0x94d   : > { %v3187_v11 = vpop.f32.mrb[15].mxu1  ;;  %v3192_v12 = vpop.f32.mrb[17].mxu0 }
 0x94e   : > { %v2211_v13 = vpop.f32.mrb[18].mxu0 }
 0x94f   : > { %v3193_v14 = vpop.f32.mrb[19].mxu0 }
 0x952   : > { %v2254_v15 = vpop.f32.mrb[16].mxu1 }
 0x953   : > { %v2306_v16 = vcombine.low %v2162_v7, %v2254_v15  ;;  %v2307_v18 = vcombine.high %v2162_v7, %v2254_v15  ;;  %v3198_v17 = vpop.f32.mrb[17].mxu1  ;;  %v3341_v15 = vld [vmem:[%s3674_s23] sm:$0xff]  }
 0x954   : > { %v2257_v19 = vpop.f32.mrb[18].mxu1  ;;  %3215 = vmatpush3.bf16.msra.mxu0 %v3341_v15 }
 0x955   : > { %v3199_v38 = vpop.f32.mrb[19].mxu1  ;;  %v2314_v26 = vrot.slane %v2306_v16, %v3820_v58  ;;  %v2321_v27 = vrot.slane %v2307_v18, %v3820_v58  ;;  %v3342_v16 = vld [vmem:[%s3674_s23 + $0x8] sm:$0xff]   ;;  %3216 = vmatprep.subr.bf16.mxu0 %v3471_v2 }
 0x956   : > { %v3052_v38 = vld [vmem:[%s4166_s7] ss:$0 sm:$0xff] }
 0x958   : > { %3217 = vmatpush3.bf16.msra.mxu0 %v3342_v16 }
 0x9a4   : > { %v2300_v1 = vpop.f32.mrb[20].mxu0 }
 0x9a5   : > { %v2322_v22 = vcombine.low %v2208_v10, %v2300_v1  ;;  %v2323_v23 = vcombine.high %v2208_v10, %v2300_v1  ;;  %v3204_v24 = vpop.f32.mrb[21].mxu0 }
 0x9a6   : > { %v2303_v25 = vpop.f32.mrb[22].mxu0  ;;  %v3343_v24 = vld [vmem:[%s3680_s22] sm:$0xff]  }
 0x9a7   : > { %v2330_v28 = vrot.slane %v2322_v22, %v3820_v58  ;;  %v2337_v30 = vrot.slane %v2323_v23, %v3820_v58  ;;  %v3205_v32 = vpop.f32.mrb[23].mxu0  ;;  %v3344_v25 = vld [vmem:[%s3680_s22 + $0x8] sm:$0xff]  }
 0x9a9   : > { %v2338_v33 = vcombine.low %v2314_v26, %v2330_v28  ;;  %v2339_v34 = vcombine.high %v2314_v26, %v2330_v28  ;;  %v2354_v35 = vcombine.low %v2321_v27, %v2337_v30  ;;  %v2355_v37 = vcombine.high %v2321_v27, %v2337_v30  ;;  %v3345_v26 = vld [vmem:[%s3680_s22 + $0x10] sm:$0xff]   ;;  %v3346_v27 = vld [vmem:[%s3680_s22 + $0x18] sm:$0xff]  }
 0x9ab   : > { %v2346_v40 = vrot.slane %v2338_v33, %v3823_v63  ;;  %v2353_v42 = vrot.slane %v2339_v34, %v3823_v63  ;;  %v2362_v41 = vrot.slane %v2354_v35, %v3823_v63  ;;  %v2369_v43 = vrot.slane %v2355_v37, %v3823_v63 }
 0x9ad   : > { %v2374_v44 = vcombine.low %v2346_v40, %v2353_v42  ;;  %v3047_v45 = vcombine.high %v2346_v40, %v2353_v42  ;;  %v2390_v46 = vcombine.low %v2362_v41, %v2369_v43  ;;  %v3048_v48 = vcombine.high %v2362_v41, %v2369_v43 }
 0x9af   : > { %v2381_v49 = vrot.slane %v2374_v44, %v3820_v58  ;;  %v2389_v50 = vrot.slane %v3047_v45, %v3820_v58  ;;  %v2397_v51 = vrot.slane %v2390_v46, %v3820_v58  ;;  %v2405_v52 = vrot.slane %v3048_v48, %v3820_v58 }
 0x9b1   : > { %v2407_v55 = vcombine.high %v2381_v49, %v2389_v50  ;;  %v2423_v56 = vcombine.high %v2397_v51, %v2405_v52  ;;  %v2406_v57 = vcombine.low %v2381_v49, %v2389_v50  ;;  %v2422_v59 = vcombine.low %v2397_v51, %v2405_v52 }
 0x9b3   : > { %v2421_v60 = vrot.slane %v2407_v55, %v3823_v63  ;;  %v2437_v62 = vrot.slane %v2423_v56, %v3823_v63  ;;  %v2414_v29 = vrot.slane %v2406_v57, %v3823_v63  ;;  %v2430_v47 = vrot.slane %v2422_v59, %v3823_v63 }
 0x9b5   : > { %v2440_v53 = vcombine.low %v2421_v60, %v2437_v62  ;;  %v2439_v31 = vcombine.high %v2414_v29, %v2430_v47  ;;  %v2441_v0 = vcombine.high %v2421_v60, %v2437_v62  ;;  %v2438_v58 = vcombine.low %v2414_v29, %v2430_v47 }
 0x9b7   : > { %2447 = vrot.lane.b32.xlu1 %v2440_v53, %s3482_s24  ;;  %2443 = vrot.lane.b32.xlu0 %v2439_v31, %s3483_s18 }
 0x9bb   : > { %2451 = vrot.lane.b32.xlu0 %v2441_v0, %s3484_s17 }
 0xa29   : > { %v2444_v3 = vpop.permute.xlu0 %2443  ;;  %v2448_v4 = vpop.permute.xlu1 %2447 }
 0xa2a   : > { %v2454_v21 = vsel %vm1871_vm6, %v2438_v58, %v2444_v3 }
 0xa2b   : > { %v2456_v63 = vsel %vm2455_vm10, %v2454_v21, %v2448_v4 }
 0xa2d   : > { %v2452_v5 = vpop.permute.xlu0 %2451 }
 0xa2e   : > { %v2458_v6 = vsel %vm2457_vm11, %v2456_v63, %v2452_v5 }
 0xa2f   : > { %v2459_v7 = vpack.c.bf16 %v2458_v6, %v2458_v6 }
 0xa31   : > { %3211 = vmatmul.mubr.msk.bf16.vlgmr.msra.gmra.mrb[20].mxu1 %vm1011_vm3, %v2459_v7 }
 0xa32   : > { %3230 = vmatprep.mubr.msk.bf16.mxu1 %vm3472_vm4, %v3471_v2  ;;  %3223 = vmatpush3.bf16.msra.mxu1 %v3343_v24 }
 0xa33   : > { %3224 = vmatprep.subr.bf16.mxu1 %v3471_v2 }
 0xa36   : > { %3225 = vmatpush3.bf16.msra.mxu1 %v3344_v25 }
 0xa37   : > { %3226 = vmatprep.subr.bf16.mxu1 %v3471_v2 }
 0xa3a   : > { %3227 = vmatpush3.bf16.msra.mxu1 %v3345_v26 }
 0xa3b   : > { %3228 = vmatprep.subr.bf16.mxu1 %v3471_v2 }
 0xa3e   : > { %3229 = vmatpush3.bf16.msra.mxu1 %v3346_v27 }
 0xb04   : > { %v2513_v8 = vpop.f32.mrb[20].mxu1 }
 0xb05   : > { %v2519_v9 = vadd.f32 %v2513_v8, %v3739_v61  ;;  %v3212_v10 = vpop.f32.mrb[21].mxu1 }
 0xb06   : > { %v2516_v11 = vpop.f32.mrb[22].mxu1 }
 0xb07   : > { %v3213_v12 = vpop.f32.mrb[23].mxu1  ;;  %v2521_v13 = vmul.f32 %v2519_v9, %v2519_v9 }
 0xb09   : > { %v2522_v14 = vsel %vm1011_vm3, %v2521_v13, 0.0 }
 0xb0a   : > { %2523 = vadd.xlane.f32.xlu1 %v2522_v14 }
 0xb97   : > { %v2524_v18 = vpop.xlane.xlu1 %2523 }
 0xb98   : > { %v2525_v17 = vmul.f32 0.03125, %v2524_v18 }
 0xb9a   : > { %v2526_v61 = vadd.f32 1e-06, %v2525_v17 }
 0xb9c   : > { %3365 = vrsqrt.f32 %v2526_v61 }
 0xba6   : > { %v3366_v19 = vpop.eup %3365 }
 0xba7   : > { %v2528_v1 = vmul.f32 %v3366_v19, %v2519_v9 }
 0xba9   : > { %v2535_v22 = vmul.f32 %v3052_v38, %v2528_v1 }
 0xbab   : > { %v2536_v23 = vpack.c.bf16 %v2535_v22, %v2535_v22 }
 0xbad   : > { %3219 = vmatmul.mubr.msk.bf16.vlgmr.msra.gmra.mrb[24].mxu0 %vm1011_vm3, %v2536_v23 }
 0xc80   : > { %v2590_v28 = vpop.f32.mrb[24].mxu0 }
 0xc81   : > { %2597 = vrot.lane.b32.xlu0 %v2590_v28, %s3481_s1  ;;  %v3220_v30 = vpop.f32.mrb[25].mxu0  ;;  %v2601_v34 = vsub.f32 0.0, %v2590_v28 }
 0xc82   : > { %v2593_v32 = vpop.f32.mrb[26].mxu0 }
 0xc83   : > { %v3221_v33 = vpop.f32.mrb[27].mxu0  ;;  %v2602_v35 = vmul.f32 1.442695, %v2601_v34 }
 0xc85   : > { %1249 = vrot.lane.b32.xlu0 %v3796_v36, %s3475_s14  ;;  %3367 = vpow2.f32 %v2602_v35 }
 0xc89   : > { %1253 = vrot.lane.b32.xlu0 %v3779_v20, %s3481_s1 }
 0xc8f   : > { %v3368_v2 = vpop.eup %3367 }
 0xc90   : > { %v2604_v37 = vadd.f32 1.0, %v3368_v2 }
 0xc92   : > { %3369 = vrcp.f32 %v2604_v37 }
 0xc9c   : > { %v3370_v42 = vpop.eup %3369 }
 0xcf3   : > { %v2598_v39 = vpop.permute.xlu0 %2597 }
 0xcf4   : > { %v2600_v40 = vmul.f32 %v2598_v39, %v2590_v28 }
 0xcf6   : > { %v2606_v41 = vmul.f32 %v3370_v42, %v2600_v40 }
 0xcf7   : > { %v1250_v43 = vpop.permute.xlu0 %1249 }
 0xcf8   : > { %v2607_v44 = vpack.c.bf16 %v2606_v41, %v2606_v41  ;;  %1252 = vst.msk [vmem:[%s3696_s20] sm:$0xff] %vm1011_vm3, %v1250_v43  ;;  %s4168_s20 = sld [smem:[#allocation24_spill]] (!%p3061_p1) }
 0xcfa   : > { %3231 = vmatmul.mubr.msk.bf16.vlgmr.msra.gmra.mrb[24].mxu1 %vm2640_vm12, %v2607_v44 }
 0xcfb   : > { %v1254_v36 = vpop.permute.xlu0 %1253 }
 0xcfc   : > { %1256 = vst.msk [vmem:[%s3701_s21] sm:$0xff] %vm1011_vm3, %v1254_v36 }
 0xcfe   : > { %v3062_v57 = vld [vmem:[%s4168_s20] ss:$0 sm:$0xff] (!%p3061_p1) }
 0xdca   : > { %2690 = sbr.rel (%p3061_p1) target bundleno = 3701 (0xe75), region = 84 }
 0xdcd   : > { %v2678_v20 = vpop.f32.mrb[24].mxu1 }
 0xdce   : > { %v2684_v45 = vadd.f32 %v2678_v20, %v2519_v9  ;;  %v3232_v46 = vpop.f32.mrb[25].mxu1 }
 0xdcf   : > { %v2681_v48 = vpop.f32.mrb[26].mxu1 }
 0xdd0   : > { %2685 = vst.msk [vmem:[#allocation2] sm:$0xff] %vm1011_vm3, %v2684_v45  ;;  %2686 = vst.msk [vmem:[%s3703_s30] sm:$0xff] %vm1011_vm3, %v2684_v45  ;;  %v3233_v49 = vpop.f32.mrb[27].mxu1  ;;  %v2692_v50 = vmul.f32 (!%p3061_p1), %v2684_v45, %v2684_v45 }
 0xdd2   : > { %v2693_v51 = vsel %vm1011_vm3, %v2692_v50, 0.0 }
 0xdd3   : > { %2694 = vadd.xlane.f32.xlu0 %v2693_v51 }
 0xe60   : > { %v2695_v52 = vpop.xlane.xlu0 %2694 }
 0xe61   : > { %v2696_v54 = vmul.f32 0.03125, %v2695_v52 }
 0xe63   : > { %v2697_v55 = vadd.f32 1e-06, %v2696_v54 }
 0xe65   : > { %3371 = vrsqrt.f32 %v2697_v55 }
 0xe6f   : > { %v3372_v56 = vpop.eup %3371 }
 0xe70   : > { %v2699_v59 = vmul.f32 %v3372_v56, %v2684_v45 }
 0xe72   : > { %v2706_v60 = vmul.f32 %v3062_v57, %v2699_v59 }
 0xe74   : > { %2707 = vst.msk [vmem:[%s3703_s30] sm:$0xff] %vm1011_vm3, %v2706_v60 }
 0xe75 PF: > { %s4169_s21 = sld [smem:[#allocation10_spill]]  ;;  %s4170_s8 = sld [smem:[#allocation7_spill]] }
 0xe76   : > { %s4172_s4 = sld [smem:[#allocation27_spill]]  ;;  %s2738_s2 = sshll.u32 %s3703_s30, 4  ;;  %s2739_s2 = int_to_ptr.vmem [resolvable:$true] %s2738_s2 }
 0xe77   : > { %s3373_s18 = scalar_lea.vmem %s2739_s2, 128  ;;  %s3485_s17 = smov [#allocation3]  }
 0xe78   : > { %p3374_p2 = scmp.ne.s32.totalorder %s2739_s2, %s3373_s18  ;;  %s3377_s28 = sshll.u32 %s3485_s17, 4  ;;  %s3378_s28 = int_to_ptr.vmem [resolvable:$false] %s3377_s28 }
 0xe79   : > { %s3379_s29 = scalar_lea.vmem %s3378_s28, 256  ;;  %p3380_p6 = scmp.lt.s32.totalorder %s2739_s2, %s3378_s28 }
 0xe7a   : > { %p3375_p4 = pnand %p3374_p2, %p3620_p3  ;;  %p3381_p7 = scmp.lt.s32.totalorder %s3379_s29, %s3373_s18 }
 0xe7b   : > { %s3064_s25 = sshll.u32 %s4169_s21, 7  ;;  %s4173_s1 = sand.u32 1, %s4170_s8  }
 0xe7c   : > { %s4047_s27 = scalar_lea.hbm %s4172_s4, %s3064_s25  ;;  %s2709_s24 = scalar_lea.sflag [#allocation4], %s4173_s1 }
 0xe7d   : > { %p3376_p5 = pneg %p3375_p4  ;;  %p3382_p8 = por %p3381_p7, %p3380_p6 }
 0xe7f   : > { %p3383_p10 = pnand %p3382_p8, %p3376_p5 }
 0xe81   : > { %3386 = shalt.err (!%p3383_p10)
}
 0xe82   : > { %s3387_s30 = scalar_lea.hbm %s4047_s27, 128  ;;  %s3391_s23 = scalar_lea.hbm %s4172_s4, 256 }
 0xe83   : > { %p3388_p11 = scmp.ne.s32.totalorder %s4047_s27, %s3387_s30  ;;  %p3392_p0 = scmp.lt.u32.totalorder %s4047_s27, %s4172_s4 }
 0xe84   : > { %p3393_p1 = scmp.lt.u32.totalorder %s3391_s23, %s3387_s30  ;;  %p3395_p4 = scmp.lt.u32.totalorder %s3387_s30, %s4047_s27 }
 0xe85   : > { %p3389_p12 = pnand %p3388_p11, %p3620_p3 }
 0xe86   : > { %p3394_p2 = por %p3393_p1, %p3392_p0 }
 0xe87   : > { %p3390_p13 = pneg %p3389_p12 }
 0xe88   : > { %p3396_p5 = por %p3395_p4, %p3394_p2 }
 0xe8a   : > { %p3397_p6 = pnand %p3396_p5, %p3390_p13 }
 0xe8c   : > { %3400 = shalt.err (!%p3397_p6)
}
 0xe8d   : > { %3246 = dma.vmem_to_hbm [thread:$0]  (%p3620_p3), %s2739_s2, 128, %s4047_s27, %s2709_s24  }
 0xe8e PF: > { %s4174_s21 = sld [smem:[#allocation13_spill]]  ;;  %s4175_s8 = sld [smem:[#allocation6_spill]] }
 0xe94   : > { %p3252_p7 = scmp.ge.s32.totalorder %s4174_s21, 2  ;;  %s2756_s26 = sand.u32 1, %s4175_s8  }
 0xe95   : > { %s2757_s5 = scalar_lea.sflag [#allocation4], %s2756_s26 }
 0xe96   : > { %p3249_p8 = pnand %p3252_p7, %p3630_p9 }
 0xe98   : > { %3434 = dma.done.wait (!%p3249_p8), %s2757_s5, 128  }
 0xe99   : > { %3436 = vsyncadd (!%p3249_p8), %s2757_s5, 4294967168  ;;  %s30_s28 = sadd.s32 1, %s4174_s21   ;;  %s4177_s21 = sld [smem:[#allocation7_spill]] }
 0xe9a   : > { %p27_p10 = scmp.ge.s32.totalorder %s30_s28, 6   ;;  %s4178_s22 = sld [smem:[#allocation8_spill]] }
 0xe9b   : > { %s4179_s23 = sld [smem:[#allocation18_spill]]  ;;  %s4180_s24 = sld [smem:[#allocation11_spill]] }
 0xe9c   : > { %s4181_s25 = sld [smem:[#allocation12_spill]]  ;;  %s4182_s26 = sld [smem:[#allocation14_spill]] }
 0xe9d   : > { %s4183_s27 = sld [smem:[#allocation16_spill]]  ;;  %29 = sbr.rel (!%p27_p10) target bundleno = 15 (0xf), region = 167 }
 0xea4   :  { %2784 = vsyncpa [#allocation4], 1 }
 0xea5   :  { %2786 = vsyncpa [#allocation4 + $0x1], 1 }

</bundles_post_ra>
